<compile_context>
chip_gen: v5e
topology: v5e:2x2
jax: 0.10.0
libtpu: 0.0.40
codegen_flags: <defaults>
</compile_context>

<pallas_src>
import functools

import jax
import jax.numpy as jnp
from jax import lax
from jax.experimental import pallas as pl
from jax.experimental.pallas import tpu as pltpu


# ---------------------------------------------------------------------------
# Fused cross-attention kernel: one grid step = one Q-row tile.
# Batch and heads are static (unrolled) loops inside the body.
# ---------------------------------------------------------------------------
def _cross_attn_kernel(x_ref, ctx_ref, kbias_ref, wq_ref, wk_ref, wv_ref,
                       wo_ref, bo_ref, o_ref, *, batch, heads, approx_recip):
    # x_ref     : (B, tq, Dq)   f32
    # ctx_ref   : (B, Nk, Dc)   f32
    # kbias_ref : (B, 1,  Nk)   f32 additive key-padding bias (0 / -max/2)
    # wq_ref    : (H, Dq, Dh)   bf16 (softmax scale pre-folded into Wq)
    # wk_ref    : (H, Dc, Dh)   bf16
    # wv_ref    : (H, Dc, Dh)   bf16
    # wo_ref    : (H, Dh, Dq)   bf16
    # bo_ref    : (1, Dq)       f32
    # o_ref     : (B, tq, Dq)   f32
    tq = x_ref.shape[1]
    dq_out = wo_ref.shape[2]

    for b in range(batch):
        # Cast activations to bf16 for the MXU; accumulate in f32.
        x = x_ref[b].astype(jnp.bfloat16)       # (tq, Dq)
        ctx = ctx_ref[b].astype(jnp.bfloat16)   # (Nk, Dc)
        kbias = kbias_ref[b]                    # (1, Nk) f32

        acc = jnp.zeros((tq, dq_out), jnp.float32)

        # Static per-head loop; per-head weights are a leading-axis index
        # (avoids narrow lane-window slices of a fused projection).
        for h in range(heads):
            q_h = jnp.dot(x, wq_ref[h], preferred_element_type=jnp.float32)   # (tq, Dh)
            k_h = jnp.dot(ctx, wk_ref[h], preferred_element_type=jnp.float32)  # (Nk, Dh)
            v_h = jnp.dot(ctx, wv_ref[h], preferred_element_type=jnp.float32)  # (Nk, Dh)

            # scores = (scale * q_h) @ k_h^T  (scale already baked into Wq),
            # contraction expressed via dot_general (no explicit transpose op).
            s = lax.dot_general(
                q_h.astype(jnp.bfloat16), k_h.astype(jnp.bfloat16),
                (((1,), (1,)), ((), ())),
                preferred_element_type=jnp.float32)                            # (tq, Nk)
            # Additive mask bias stays f32 (-finfo(f32).max/2 overflows bf16).
            s = s + kbias

            # Softmax in f32. Note: fully-masked rows degrade to a uniform
            # distribution over keys (exp(0) everywhere after max-subtraction),
            # exactly matching the PyTorch additive-bias reference behavior.
            m = jnp.max(s, axis=-1, keepdims=True)
            e = jnp.exp(s - m)
            denom = jnp.sum(e, axis=-1, keepdims=True)
            if approx_recip:
                p = e * pl.reciprocal(denom, approx=True)   # EUP vrcp slot
            else:
                p = e / denom

            o_h = jnp.dot(p.astype(jnp.bfloat16), v_h.astype(jnp.bfloat16),
                          preferred_element_type=jnp.float32)                  # (tq, Dh)
            # Fold the head straight into the output projection:
            #   concat_h(o_h) @ Wo^T == sum_h o_h @ Wo^T[h*Dh:(h+1)*Dh, :]
            acc = acc + jnp.dot(o_h.astype(jnp.bfloat16), wo_ref[h],
                                preferred_element_type=jnp.float32)            # (tq, Dq)

        # TODO(synk): Dq=32 (<128 lanes) makes this a masked vst at toy shapes;
        # for real shapes keep the output feature dim a multiple of 128.
        o_ref[b] = acc + bo_ref[...]


# ---------------------------------------------------------------------------
# One-time parameter preparation (setup-time, NOT per forward call):
#   pre-transpose, split heads, fold softmax scale into Wq, cast to bf16.
# ---------------------------------------------------------------------------
def prepare_cross_attn_params(wq, wk, wv, wo, bo, heads):
    inner, query_dim = wq.shape
    context_dim = wk.shape[1]
    dim_head = inner // heads
    scale = dim_head ** (-0.5)

    def split_heads(w_t):  # (in_dim, inner) -> (H, in_dim, Dh)
        in_dim = w_t.shape[0]
        return w_t.reshape(in_dim, heads, dim_head).transpose(1, 0, 2)

    wq_h = split_heads(wq.T * scale).astype(jnp.bfloat16)       # (H, Dq, Dh)
    wk_h = split_heads(wk.T).astype(jnp.bfloat16)                # (H, Dc, Dh)
    wv_h = split_heads(wv.T).astype(jnp.bfloat16)                # (H, Dc, Dh)
    wo_h = wo.T.reshape(heads, dim_head, query_dim).astype(jnp.bfloat16)  # (H, Dh, Dq)
    bo2 = bo.reshape(1, query_dim).astype(jnp.float32)
    return wq_h, wk_h, wv_h, wo_h, bo2


# ---------------------------------------------------------------------------
# Wrapper: one fused pallas_call; grid only over Q-row tiles.
# ---------------------------------------------------------------------------
def flash_cross_attn_wg(x, context, mask, params, heads, *, q_tile=512,
                        approx_recip=True):
    wq_h, wk_h, wv_h, wo_h, bo2 = params
    B, Nq, Dq = x.shape
    _, Nk, Dc = context.shape
    dim_head = wq_h.shape[2]

    # Compact additive key bias (B, 1, Nk) — no (B, H, Nq, Nk) HBM blow-up.
    # TODO(synk): only key-padding masks (broadcastable over heads / queries)
    # are supported by this wrapper, matching the module's intended use.
    max_neg = -jnp.finfo(jnp.float32).max / 2
    mask_k = jnp.broadcast_to(mask, (B, 1, 1, Nk)).reshape(B, 1, Nk)
    kbias = jnp.where(mask_k, jnp.float32(0.0), jnp.float32(max_neg))

    tq = Nq if Nq <= q_tile else q_tile
    grid = (pl.cdiv(Nq, tq),)

    kernel = functools.partial(_cross_attn_kernel, batch=B, heads=heads,
                               approx_recip=approx_recip)

    return pl.pallas_call(
        kernel,
        out_shape=jax.ShapeDtypeStruct((B, Nq, Dq), jnp.float32),
        grid=grid,
        in_specs=[
            pl.BlockSpec((B, tq, Dq), lambda i: (0, i, 0)),            # x Q-tile
            pl.BlockSpec((B, Nk, Dc), lambda i: (0, 0, 0)),            # context (resident)
            pl.BlockSpec((B, 1, Nk), lambda i: (0, 0, 0)),             # key bias (resident)
            pl.BlockSpec((heads, Dq, dim_head), lambda i: (0, 0, 0)),  # Wq (scaled, bf16)
            pl.BlockSpec((heads, Dc, dim_head), lambda i: (0, 0, 0)),  # Wk
            pl.BlockSpec((heads, Dc, dim_head), lambda i: (0, 0, 0)),  # Wv
            pl.BlockSpec((heads, dim_head, Dq), lambda i: (0, 0, 0)),  # Wo
            pl.BlockSpec((1, Dq), lambda i: (0, 0)),                   # bo
        ],
        out_specs=pl.BlockSpec((B, tq, Dq), lambda i: (0, i, 0)),
        compiler_params=pltpu.CompilerParams(
            dimension_semantics=("parallel",),
            vmem_limit_bytes=32 * 1024 * 1024,
        ),
    )(x, context, kbias, wq_h, wk_h, wv_h, wo_h, bo2)


# ---------------------------------------------------------------------------
# Pure-JAX f32 reference (exact module math) for the correctness check
# ---------------------------------------------------------------------------
def reference_cross_attn(x, context, mask, wq, wk, wv, wo, bo, heads):
    B, Nq, _ = x.shape
    _, Nk, _ = context.shape
    inner = wq.shape[0]
    dh = inner // heads
    scale = dh ** (-0.5)

    q = (x @ wq.T).reshape(B, Nq, heads, dh)
    k = (context @ wk.T).reshape(B, Nk, heads, dh)
    v = (context @ wv.T).reshape(B, Nk, heads, dh)

    max_neg = -jnp.finfo(jnp.float32).max / 2
    sim = jnp.where(mask, jnp.float32(0.0), jnp.float32(max_neg))
    sim = jnp.broadcast_to(sim, (B, heads, Nq, Nk))

    s = jnp.einsum("bqhd,bkhd->bhqk", q, k) * scale + sim
    p = jax.nn.softmax(s, axis=-1)
    o = jnp.einsum("bhqk,bkhd->bqhd", p, v).reshape(B, Nq, inner)
    return o @ wo.T + bo


if __name__ == "__main__":
    # Small shapes consistent with the module: heads=4, dim_head=8 -> inner=32,
    # query_dim=32, context_dim=16, batch=2, query seq=8, context seq=16.
    B, Nq, Nk = 2, 8, 16
    query_dim, context_dim = 32, 16
    heads, dim_head = 4, 8
    inner = heads * dim_head

    key = jax.random.PRNGKey(0)
    kx, kc, k1, k2, k3, k4, k5 = jax.random.split(key, 7)

    x = jax.random.normal(kx, (B, Nq, query_dim), dtype=jnp.float32)
    context = jax.random.normal(kc, (B, Nk, context_dim), dtype=jnp.float32)

    # Synthetic deterministic parameters (to_q/to_k/to_v have no bias;
    # to_out Linear has a bias).
    wq = jax.random.normal(k1, (inner, query_dim), dtype=jnp.float32) * 0.1
    wk = jax.random.normal(k2, (inner, context_dim), dtype=jnp.float32) * 0.1
    wv = jax.random.normal(k3, (inner, context_dim), dtype=jnp.float32) * 0.1
    wo = jax.random.normal(k4, (query_dim, inner), dtype=jnp.float32) * 0.1
    bo = jax.random.normal(k5, (query_dim,), dtype=jnp.float32) * 0.1

    # Boolean key-padding mask, broadcastable to (B, H, Nq, Nk).
    lengths = jnp.array([Nk, 10])
    mask = (jnp.arange(Nk)[None, :] < lengths[:, None]).reshape(B, 1, 1, Nk)

    # One-time parameter prep (head split / transpose / scale fold / bf16).
    params = prepare_cross_attn_params(wq, wk, wv, wo, bo, heads)

    # TODO(synk): Dropout(p=0.0) in to_out is an identity in the forward pass
    # and is intentionally not implemented as a kernel.
    out = flash_cross_attn_wg(x, context, mask, params, heads)
    out = jax.block_until_ready(out)

    ref = reference_cross_attn(x, context, mask, wq, wk, wv, wo, bo, heads)
    assert out.shape == (B, Nq, query_dim)
    # Tolerance widened vs the all-f32 version: matmul operands are bf16
    # (f32 accumulation) and the softmax denominator uses the approximate
    # EUP reciprocal.
    assert jnp.allclose(out, ref, atol=5e-3, rtol=5e-3), "mismatch vs reference"

    print("KERNEL_OK")
</pallas_src>

<mosaic_0001>
module attributes {stable_mosaic.version = 11 : i64} {
  func.func @_cross_attn_kernel(%arg0: i32, %arg1: memref<2x8x32xf32, #tpu.memory_space<vmem>>, %arg2: memref<2x16x16xf32, #tpu.memory_space<vmem>>, %arg3: memref<2x1x16xf32, #tpu.memory_space<vmem>>, %arg4: memref<4x32x8xbf16, #tpu.memory_space<vmem>>, %arg5: memref<4x16x8xbf16, #tpu.memory_space<vmem>>, %arg6: memref<4x16x8xbf16, #tpu.memory_space<vmem>>, %arg7: memref<4x8x32xbf16, #tpu.memory_space<vmem>>, %arg8: memref<1x32xf32, #tpu.memory_space<vmem>>, %arg9: memref<2x8x32xf32, #tpu.memory_space<vmem>>) attributes {dimension_semantics = [#tpu.dimension_semantics<parallel>], iteration_bounds = array<i64: 1>, scalar_prefetch = 0 : i64, scratch_operands = 0 : i64, tpu.core_type = #tpu.core_type<tc>, window_params = [{transform_indices = @transform_0, window_bounds = array<i64: 2, 8, 32>}, {pipeline_mode = #tpu.pipeline_mode<synchronous>, transform_indices = @transform_1, window_bounds = array<i64: 2, 16, 16>}, {pipeline_mode = #tpu.pipeline_mode<synchronous>, transform_indices = @transform_2, window_bounds = array<i64: 2, 1, 16>}, {pipeline_mode = #tpu.pipeline_mode<synchronous>, transform_indices = @transform_3, window_bounds = array<i64: 4, 32, 8>}, {pipeline_mode = #tpu.pipeline_mode<synchronous>, transform_indices = @transform_4, window_bounds = array<i64: 4, 16, 8>}, {pipeline_mode = #tpu.pipeline_mode<synchronous>, transform_indices = @transform_5, window_bounds = array<i64: 4, 16, 8>}, {pipeline_mode = #tpu.pipeline_mode<synchronous>, transform_indices = @transform_6, window_bounds = array<i64: 4, 8, 32>}, {pipeline_mode = #tpu.pipeline_mode<synchronous>, transform_indices = @transform_7, window_bounds = array<i64: 1, 32>}, {transform_indices = @transform_8, window_bounds = array<i64: 2, 8, 32>}]} {
    %c0 = arith.constant 0 : index
    %c0_0 = arith.constant 0 : index
    %c0_1 = arith.constant 0 : index
    %0 = vector.load %arg1[%c0, %c0_0, %c0_1] : memref<2x8x32xf32, #tpu.memory_space<vmem>>, vector<1x8x32xf32>
    %1 = vector.shape_cast %0 : vector<1x8x32xf32> to vector<8x32xf32>
    %2 = arith.truncf %1 : vector<8x32xf32> to vector<8x32xbf16>
    %c0_2 = arith.constant 0 : index
    %c0_3 = arith.constant 0 : index
    %c0_4 = arith.constant 0 : index
    %3 = vector.load %arg2[%c0_2, %c0_3, %c0_4] : memref<2x16x16xf32, #tpu.memory_space<vmem>>, vector<1x16x16xf32>
    %4 = vector.shape_cast %3 : vector<1x16x16xf32> to vector<16x16xf32>
    %5 = arith.truncf %4 : vector<16x16xf32> to vector<16x16xbf16>
    %c0_5 = arith.constant 0 : index
    %c0_6 = arith.constant 0 : index
    %c0_7 = arith.constant 0 : index
    %6 = vector.load %arg3[%c0_5, %c0_6, %c0_7] : memref<2x1x16xf32, #tpu.memory_space<vmem>>, vector<1x1x16xf32>
    %7 = vector.shape_cast %6 : vector<1x1x16xf32> to vector<1x16xf32>
    %cst = arith.constant 0.000000e+00 : f32
    %8 = vector.broadcast %cst : f32 to vector<8x32xf32>
    %c0_8 = arith.constant 0 : index
    %c0_9 = arith.constant 0 : index
    %c0_10 = arith.constant 0 : index
    %9 = vector.load %arg4[%c0_8, %c0_9, %c0_10] : memref<4x32x8xbf16, #tpu.memory_space<vmem>>, vector<1x32x8xbf16>
    %10 = vector.shape_cast %9 : vector<1x32x8xbf16> to vector<32x8xbf16>
    %cst_11 = arith.constant dense<0.000000e+00> : vector<8x8xf32>
    %11 = tpu.matmul %2, %10, %cst_11 {dimension_numbers = #tpu.dot_dimension_numbers<[1], [0], [0], [1], [0, 0, 1, 1], [], []>} : vector<8x32xbf16>, vector<32x8xbf16>, vector<8x8xf32> -> vector<8x8xf32>
    %c0_12 = arith.constant 0 : index
    %c0_13 = arith.constant 0 : index
    %c0_14 = arith.constant 0 : index
    %12 = vector.load %arg5[%c0_12, %c0_13, %c0_14] : memref<4x16x8xbf16, #tpu.memory_space<vmem>>, vector<1x16x8xbf16>
    %13 = vector.shape_cast %12 : vector<1x16x8xbf16> to vector<16x8xbf16>
    %cst_15 = arith.constant dense<0.000000e+00> : vector<16x8xf32>
    %14 = tpu.matmul %5, %13, %cst_15 {dimension_numbers = #tpu.dot_dimension_numbers<[1], [0], [0], [1], [0, 0, 1, 1], [], []>} : vector<16x16xbf16>, vector<16x8xbf16>, vector<16x8xf32> -> vector<16x8xf32>
    %c0_16 = arith.constant 0 : index
    %c0_17 = arith.constant 0 : index
    %c0_18 = arith.constant 0 : index
    %15 = vector.load %arg6[%c0_16, %c0_17, %c0_18] : memref<4x16x8xbf16, #tpu.memory_space<vmem>>, vector<1x16x8xbf16>
    %16 = vector.shape_cast %15 : vector<1x16x8xbf16> to vector<16x8xbf16>
    %cst_19 = arith.constant dense<0.000000e+00> : vector<16x8xf32>
    %17 = tpu.matmul %5, %16, %cst_19 {dimension_numbers = #tpu.dot_dimension_numbers<[1], [0], [0], [1], [0, 0, 1, 1], [], []>} : vector<16x16xbf16>, vector<16x8xbf16>, vector<16x8xf32> -> vector<16x8xf32>
    %18 = arith.truncf %11 : vector<8x8xf32> to vector<8x8xbf16>
    %19 = arith.truncf %14 : vector<16x8xf32> to vector<16x8xbf16>
    %cst_20 = arith.constant dense<0.000000e+00> : vector<8x16xf32>
    %20 = tpu.matmul %18, %19, %cst_20 {dimension_numbers = #tpu.dot_dimension_numbers<[1], [1], [0], [0], [0, 0, 1, 0], [], []>} : vector<8x8xbf16>, vector<16x8xbf16>, vector<8x16xf32> -> vector<8x16xf32>
    %21 = vector.broadcast %7 : vector<1x16xf32> to vector<8x16xf32>
    %22 = arith.addf %20, %21 : vector<8x16xf32>
    %cst_21 = arith.constant dense<0xFF800000> : vector<8xf32>
    %23 = vector.multi_reduction <maximumf>, %22, %cst_21 [1] : vector<8x16xf32> to vector<8xf32>
    %24 = vector.shape_cast %23 : vector<8xf32> to vector<8x1xf32>
    %25 = vector.broadcast %24 : vector<8x1xf32> to vector<8x16xf32>
    %26 = arith.subf %22, %25 : vector<8x16xf32>
    %27 = math.exp %26 : vector<8x16xf32>
    %cst_22 = arith.constant dense<0.000000e+00> : vector<8xf32>
    %28 = vector.multi_reduction <add>, %27, %cst_22 [1] : vector<8x16xf32> to vector<8xf32>
    %29 = vector.shape_cast %28 : vector<8xf32> to vector<8x1xf32>
    %30 = tpu.reciprocal %29 {approx = true} : vector<8x1xf32> -> vector<8x1xf32>
    %31 = vector.broadcast %30 : vector<8x1xf32> to vector<8x16xf32>
    %32 = arith.mulf %27, %31 : vector<8x16xf32>
    %33 = arith.truncf %32 : vector<8x16xf32> to vector<8x16xbf16>
    %34 = arith.truncf %17 : vector<16x8xf32> to vector<16x8xbf16>
    %cst_23 = arith.constant dense<0.000000e+00> : vector<8x8xf32>
    %35 = tpu.matmul %33, %34, %cst_23 {dimension_numbers = #tpu.dot_dimension_numbers<[1], [0], [0], [1], [0, 0, 1, 1], [], []>} : vector<8x16xbf16>, vector<16x8xbf16>, vector<8x8xf32> -> vector<8x8xf32>
    %36 = arith.truncf %35 : vector<8x8xf32> to vector<8x8xbf16>
    %c0_24 = arith.constant 0 : index
    %c0_25 = arith.constant 0 : index
    %c0_26 = arith.constant 0 : index
    %37 = vector.load %arg7[%c0_24, %c0_25, %c0_26] : memref<4x8x32xbf16, #tpu.memory_space<vmem>>, vector<1x8x32xbf16>
    %38 = vector.shape_cast %37 : vector<1x8x32xbf16> to vector<8x32xbf16>
    %cst_27 = arith.constant dense<0.000000e+00> : vector<8x32xf32>
    %39 = tpu.matmul %36, %38, %cst_27 {dimension_numbers = #tpu.dot_dimension_numbers<[1], [0], [0], [1], [0, 0, 1, 1], [], []>} : vector<8x8xbf16>, vector<8x32xbf16>, vector<8x32xf32> -> vector<8x32xf32>
    %40 = arith.addf %8, %39 : vector<8x32xf32>
    %c1 = arith.constant 1 : index
    %c0_28 = arith.constant 0 : index
    %c0_29 = arith.constant 0 : index
    %41 = vector.load %arg4[%c1, %c0_28, %c0_29] : memref<4x32x8xbf16, #tpu.memory_space<vmem>>, vector<1x32x8xbf16>
    %42 = vector.shape_cast %41 : vector<1x32x8xbf16> to vector<32x8xbf16>
    %cst_30 = arith.constant dense<0.000000e+00> : vector<8x8xf32>
    %43 = tpu.matmul %2, %42, %cst_30 {dimension_numbers = #tpu.dot_dimension_numbers<[1], [0], [0], [1], [0, 0, 1, 1], [], []>} : vector<8x32xbf16>, vector<32x8xbf16>, vector<8x8xf32> -> vector<8x8xf32>
    %c1_31 = arith.constant 1 : index
    %c0_32 = arith.constant 0 : index
    %c0_33 = arith.constant 0 : index
    %44 = vector.load %arg5[%c1_31, %c0_32, %c0_33] : memref<4x16x8xbf16, #tpu.memory_space<vmem>>, vector<1x16x8xbf16>
    %45 = vector.shape_cast %44 : vector<1x16x8xbf16> to vector<16x8xbf16>
    %cst_34 = arith.constant dense<0.000000e+00> : vector<16x8xf32>
    %46 = tpu.matmul %5, %45, %cst_34 {dimension_numbers = #tpu.dot_dimension_numbers<[1], [0], [0], [1], [0, 0, 1, 1], [], []>} : vector<16x16xbf16>, vector<16x8xbf16>, vector<16x8xf32> -> vector<16x8xf32>
    %c1_35 = arith.constant 1 : index
    %c0_36 = arith.constant 0 : index
    %c0_37 = arith.constant 0 : index
    %47 = vector.load %arg6[%c1_35, %c0_36, %c0_37] : memref<4x16x8xbf16, #tpu.memory_space<vmem>>, vector<1x16x8xbf16>
    %48 = vector.shape_cast %47 : vector<1x16x8xbf16> to vector<16x8xbf16>
    %cst_38 = arith.constant dense<0.000000e+00> : vector<16x8xf32>
    %49 = tpu.matmul %5, %48, %cst_38 {dimension_numbers = #tpu.dot_dimension_numbers<[1], [0], [0], [1], [0, 0, 1, 1], [], []>} : vector<16x16xbf16>, vector<16x8xbf16>, vector<16x8xf32> -> vector<16x8xf32>
    %50 = arith.truncf %43 : vector<8x8xf32> to vector<8x8xbf16>
    %51 = arith.truncf %46 : vector<16x8xf32> to vector<16x8xbf16>
    %cst_39 = arith.constant dense<0.000000e+00> : vector<8x16xf32>
    %52 = tpu.matmul %50, %51, %cst_39 {dimension_numbers = #tpu.dot_dimension_numbers<[1], [1], [0], [0], [0, 0, 1, 0], [], []>} : vector<8x8xbf16>, vector<16x8xbf16>, vector<8x16xf32> -> vector<8x16xf32>
    %53 = vector.broadcast %7 : vector<1x16xf32> to vector<8x16xf32>
    %54 = arith.addf %52, %53 : vector<8x16xf32>
    %cst_40 = arith.constant dense<0xFF800000> : vector<8xf32>
    %55 = vector.multi_reduction <maximumf>, %54, %cst_40 [1] : vector<8x16xf32> to vector<8xf32>
    %56 = vector.shape_cast %55 : vector<8xf32> to vector<8x1xf32>
    %57 = vector.broadcast %56 : vector<8x1xf32> to vector<8x16xf32>
    %58 = arith.subf %54, %57 : vector<8x16xf32>
    %59 = math.exp %58 : vector<8x16xf32>
    %cst_41 = arith.constant dense<0.000000e+00> : vector<8xf32>
    %60 = vector.multi_reduction <add>, %59, %cst_41 [1] : vector<8x16xf32> to vector<8xf32>
    %61 = vector.shape_cast %60 : vector<8xf32> to vector<8x1xf32>
    %62 = tpu.reciprocal %61 {approx = true} : vector<8x1xf32> -> vector<8x1xf32>
    %63 = vector.broadcast %62 : vector<8x1xf32> to vector<8x16xf32>
    %64 = arith.mulf %59, %63 : vector<8x16xf32>
    %65 = arith.truncf %64 : vector<8x16xf32> to vector<8x16xbf16>
    %66 = arith.truncf %49 : vector<16x8xf32> to vector<16x8xbf16>
    %cst_42 = arith.constant dense<0.000000e+00> : vector<8x8xf32>
    %67 = tpu.matmul %65, %66, %cst_42 {dimension_numbers = #tpu.dot_dimension_numbers<[1], [0], [0], [1], [0, 0, 1, 1], [], []>} : vector<8x16xbf16>, vector<16x8xbf16>, vector<8x8xf32> -> vector<8x8xf32>
    %68 = arith.truncf %67 : vector<8x8xf32> to vector<8x8xbf16>
    %c1_43 = arith.constant 1 : index
    %c0_44 = arith.constant 0 : index
    %c0_45 = arith.constant 0 : index
    %69 = vector.load %arg7[%c1_43, %c0_44, %c0_45] : memref<4x8x32xbf16, #tpu.memory_space<vmem>>, vector<1x8x32xbf16>
    %70 = vector.shape_cast %69 : vector<1x8x32xbf16> to vector<8x32xbf16>
    %cst_46 = arith.constant dense<0.000000e+00> : vector<8x32xf32>
    %71 = tpu.matmul %68, %70, %cst_46 {dimension_numbers = #tpu.dot_dimension_numbers<[1], [0], [0], [1], [0, 0, 1, 1], [], []>} : vector<8x8xbf16>, vector<8x32xbf16>, vector<8x32xf32> -> vector<8x32xf32>
    %72 = arith.addf %40, %71 : vector<8x32xf32>
    %c2 = arith.constant 2 : index
    %c0_47 = arith.constant 0 : index
    %c0_48 = arith.constant 0 : index
    %73 = vector.load %arg4[%c2, %c0_47, %c0_48] : memref<4x32x8xbf16, #tpu.memory_space<vmem>>, vector<1x32x8xbf16>
    %74 = vector.shape_cast %73 : vector<1x32x8xbf16> to vector<32x8xbf16>
    %cst_49 = arith.constant dense<0.000000e+00> : vector<8x8xf32>
    %75 = tpu.matmul %2, %74, %cst_49 {dimension_numbers = #tpu.dot_dimension_numbers<[1], [0], [0], [1], [0, 0, 1, 1], [], []>} : vector<8x32xbf16>, vector<32x8xbf16>, vector<8x8xf32> -> vector<8x8xf32>
    %c2_50 = arith.constant 2 : index
    %c0_51 = arith.constant 0 : index
    %c0_52 = arith.constant 0 : index
    %76 = vector.load %arg5[%c2_50, %c0_51, %c0_52] : memref<4x16x8xbf16, #tpu.memory_space<vmem>>, vector<1x16x8xbf16>
    %77 = vector.shape_cast %76 : vector<1x16x8xbf16> to vector<16x8xbf16>
    %cst_53 = arith.constant dense<0.000000e+00> : vector<16x8xf32>
    %78 = tpu.matmul %5, %77, %cst_53 {dimension_numbers = #tpu.dot_dimension_numbers<[1], [0], [0], [1], [0, 0, 1, 1], [], []>} : vector<16x16xbf16>, vector<16x8xbf16>, vector<16x8xf32> -> vector<16x8xf32>
    %c2_54 = arith.constant 2 : index
    %c0_55 = arith.constant 0 : index
    %c0_56 = arith.constant 0 : index
    %79 = vector.load %arg6[%c2_54, %c0_55, %c0_56] : memref<4x16x8xbf16, #tpu.memory_space<vmem>>, vector<1x16x8xbf16>
    %80 = vector.shape_cast %79 : vector<1x16x8xbf16> to vector<16x8xbf16>
    %cst_57 = arith.constant dense<0.000000e+00> : vector<16x8xf32>
    %81 = tpu.matmul %5, %80, %cst_57 {dimension_numbers = #tpu.dot_dimension_numbers<[1], [0], [0], [1], [0, 0, 1, 1], [], []>} : vector<16x16xbf16>, vector<16x8xbf16>, vector<16x8xf32> -> vector<16x8xf32>
    %82 = arith.truncf %75 : vector<8x8xf32> to vector<8x8xbf16>
    %83 = arith.truncf %78 : vector<16x8xf32> to vector<16x8xbf16>
    %cst_58 = arith.constant dense<0.000000e+00> : vector<8x16xf32>
    %84 = tpu.matmul %82, %83, %cst_58 {dimension_numbers = #tpu.dot_dimension_numbers<[1], [1], [0], [0], [0, 0, 1, 0], [], []>} : vector<8x8xbf16>, vector<16x8xbf16>, vector<8x16xf32> -> vector<8x16xf32>
    %85 = vector.broadcast %7 : vector<1x16xf32> to vector<8x16xf32>
    %86 = arith.addf %84, %85 : vector<8x16xf32>
    %cst_59 = arith.constant dense<0xFF800000> : vector<8xf32>
    %87 = vector.multi_reduction <maximumf>, %86, %cst_59 [1] : vector<8x16xf32> to vector<8xf32>
    %88 = vector.shape_cast %87 : vector<8xf32> to vector<8x1xf32>
    %89 = vector.broadcast %88 : vector<8x1xf32> to vector<8x16xf32>
    %90 = arith.subf %86, %89 : vector<8x16xf32>
    %91 = math.exp %90 : vector<8x16xf32>
    %cst_60 = arith.constant dense<0.000000e+00> : vector<8xf32>
    %92 = vector.multi_reduction <add>, %91, %cst_60 [1] : vector<8x16xf32> to vector<8xf32>
    %93 = vector.shape_cast %92 : vector<8xf32> to vector<8x1xf32>
    %94 = tpu.reciprocal %93 {approx = true} : vector<8x1xf32> -> vector<8x1xf32>
    %95 = vector.broadcast %94 : vector<8x1xf32> to vector<8x16xf32>
    %96 = arith.mulf %91, %95 : vector<8x16xf32>
    %97 = arith.truncf %96 : vector<8x16xf32> to vector<8x16xbf16>
    %98 = arith.truncf %81 : vector<16x8xf32> to vector<16x8xbf16>
    %cst_61 = arith.constant dense<0.000000e+00> : vector<8x8xf32>
    %99 = tpu.matmul %97, %98, %cst_61 {dimension_numbers = #tpu.dot_dimension_numbers<[1], [0], [0], [1], [0, 0, 1, 1], [], []>} : vector<8x16xbf16>, vector<16x8xbf16>, vector<8x8xf32> -> vector<8x8xf32>
    %100 = arith.truncf %99 : vector<8x8xf32> to vector<8x8xbf16>
    %c2_62 = arith.constant 2 : index
    %c0_63 = arith.constant 0 : index
    %c0_64 = arith.constant 0 : index
    %101 = vector.load %arg7[%c2_62, %c0_63, %c0_64] : memref<4x8x32xbf16, #tpu.memory_space<vmem>>, vector<1x8x32xbf16>
    %102 = vector.shape_cast %101 : vector<1x8x32xbf16> to vector<8x32xbf16>
    %cst_65 = arith.constant dense<0.000000e+00> : vector<8x32xf32>
    %103 = tpu.matmul %100, %102, %cst_65 {dimension_numbers = #tpu.dot_dimension_numbers<[1], [0], [0], [1], [0, 0, 1, 1], [], []>} : vector<8x8xbf16>, vector<8x32xbf16>, vector<8x32xf32> -> vector<8x32xf32>
    %104 = arith.addf %72, %103 : vector<8x32xf32>
    %c3 = arith.constant 3 : index
    %c0_66 = arith.constant 0 : index
    %c0_67 = arith.constant 0 : index
    %105 = vector.load %arg4[%c3, %c0_66, %c0_67] : memref<4x32x8xbf16, #tpu.memory_space<vmem>>, vector<1x32x8xbf16>
    %106 = vector.shape_cast %105 : vector<1x32x8xbf16> to vector<32x8xbf16>
    %cst_68 = arith.constant dense<0.000000e+00> : vector<8x8xf32>
    %107 = tpu.matmul %2, %106, %cst_68 {dimension_numbers = #tpu.dot_dimension_numbers<[1], [0], [0], [1], [0, 0, 1, 1], [], []>} : vector<8x32xbf16>, vector<32x8xbf16>, vector<8x8xf32> -> vector<8x8xf32>
    %c3_69 = arith.constant 3 : index
    %c0_70 = arith.constant 0 : index
    %c0_71 = arith.constant 0 : index
    %108 = vector.load %arg5[%c3_69, %c0_70, %c0_71] : memref<4x16x8xbf16, #tpu.memory_space<vmem>>, vector<1x16x8xbf16>
    %109 = vector.shape_cast %108 : vector<1x16x8xbf16> to vector<16x8xbf16>
    %cst_72 = arith.constant dense<0.000000e+00> : vector<16x8xf32>
    %110 = tpu.matmul %5, %109, %cst_72 {dimension_numbers = #tpu.dot_dimension_numbers<[1], [0], [0], [1], [0, 0, 1, 1], [], []>} : vector<16x16xbf16>, vector<16x8xbf16>, vector<16x8xf32> -> vector<16x8xf32>
    %c3_73 = arith.constant 3 : index
    %c0_74 = arith.constant 0 : index
    %c0_75 = arith.constant 0 : index
    %111 = vector.load %arg6[%c3_73, %c0_74, %c0_75] : memref<4x16x8xbf16, #tpu.memory_space<vmem>>, vector<1x16x8xbf16>
    %112 = vector.shape_cast %111 : vector<1x16x8xbf16> to vector<16x8xbf16>
    %cst_76 = arith.constant dense<0.000000e+00> : vector<16x8xf32>
    %113 = tpu.matmul %5, %112, %cst_76 {dimension_numbers = #tpu.dot_dimension_numbers<[1], [0], [0], [1], [0, 0, 1, 1], [], []>} : vector<16x16xbf16>, vector<16x8xbf16>, vector<16x8xf32> -> vector<16x8xf32>
    %114 = arith.truncf %107 : vector<8x8xf32> to vector<8x8xbf16>
    %115 = arith.truncf %110 : vector<16x8xf32> to vector<16x8xbf16>
    %cst_77 = arith.constant dense<0.000000e+00> : vector<8x16xf32>
    %116 = tpu.matmul %114, %115, %cst_77 {dimension_numbers = #tpu.dot_dimension_numbers<[1], [1], [0], [0], [0, 0, 1, 0], [], []>} : vector<8x8xbf16>, vector<16x8xbf16>, vector<8x16xf32> -> vector<8x16xf32>
    %117 = vector.broadcast %7 : vector<1x16xf32> to vector<8x16xf32>
    %118 = arith.addf %116, %117 : vector<8x16xf32>
    %cst_78 = arith.constant dense<0xFF800000> : vector<8xf32>
    %119 = vector.multi_reduction <maximumf>, %118, %cst_78 [1] : vector<8x16xf32> to vector<8xf32>
    %120 = vector.shape_cast %119 : vector<8xf32> to vector<8x1xf32>
    %121 = vector.broadcast %120 : vector<8x1xf32> to vector<8x16xf32>
    %122 = arith.subf %118, %121 : vector<8x16xf32>
    %123 = math.exp %122 : vector<8x16xf32>
    %cst_79 = arith.constant dense<0.000000e+00> : vector<8xf32>
    %124 = vector.multi_reduction <add>, %123, %cst_79 [1] : vector<8x16xf32> to vector<8xf32>
    %125 = vector.shape_cast %124 : vector<8xf32> to vector<8x1xf32>
    %126 = tpu.reciprocal %125 {approx = true} : vector<8x1xf32> -> vector<8x1xf32>
    %127 = vector.broadcast %126 : vector<8x1xf32> to vector<8x16xf32>
    %128 = arith.mulf %123, %127 : vector<8x16xf32>
    %129 = arith.truncf %128 : vector<8x16xf32> to vector<8x16xbf16>
    %130 = arith.truncf %113 : vector<16x8xf32> to vector<16x8xbf16>
    %cst_80 = arith.constant dense<0.000000e+00> : vector<8x8xf32>
    %131 = tpu.matmul %129, %130, %cst_80 {dimension_numbers = #tpu.dot_dimension_numbers<[1], [0], [0], [1], [0, 0, 1, 1], [], []>} : vector<8x16xbf16>, vector<16x8xbf16>, vector<8x8xf32> -> vector<8x8xf32>
    %132 = arith.truncf %131 : vector<8x8xf32> to vector<8x8xbf16>
    %c3_81 = arith.constant 3 : index
    %c0_82 = arith.constant 0 : index
    %c0_83 = arith.constant 0 : index
    %133 = vector.load %arg7[%c3_81, %c0_82, %c0_83] : memref<4x8x32xbf16, #tpu.memory_space<vmem>>, vector<1x8x32xbf16>
    %134 = vector.shape_cast %133 : vector<1x8x32xbf16> to vector<8x32xbf16>
    %cst_84 = arith.constant dense<0.000000e+00> : vector<8x32xf32>
    %135 = tpu.matmul %132, %134, %cst_84 {dimension_numbers = #tpu.dot_dimension_numbers<[1], [0], [0], [1], [0, 0, 1, 1], [], []>} : vector<8x8xbf16>, vector<8x32xbf16>, vector<8x32xf32> -> vector<8x32xf32>
    %136 = arith.addf %104, %135 : vector<8x32xf32>
    %c0_85 = arith.constant 0 : index
    %c0_86 = arith.constant 0 : index
    %137 = vector.load %arg8[%c0_85, %c0_86] : memref<1x32xf32, #tpu.memory_space<vmem>>, vector<1x32xf32>
    %138 = vector.broadcast %137 : vector<1x32xf32> to vector<8x32xf32>
    %139 = arith.addf %136, %138 : vector<8x32xf32>
    %c0_87 = arith.constant 0 : index
    %c0_88 = arith.constant 0 : index
    %c0_89 = arith.constant 0 : index
    %140 = vector.load %arg9[%c0_87, %c0_88, %c0_89] : memref<2x8x32xf32, #tpu.memory_space<vmem>>, vector<1x8x32xf32>
    %141 = vector.shape_cast %140 : vector<1x8x32xf32> to vector<8x32xf32>
    %142 = vector.shape_cast %139 : vector<8x32xf32> to vector<1x8x32xf32>
    tpu.vector_store %arg9[%c0_87, %c0_88, %c0_89], %142 {strides = array<i32>} : memref<2x8x32xf32, #tpu.memory_space<vmem>>, vector<1x8x32xf32>,
    %c1_90 = arith.constant 1 : index
    %c0_91 = arith.constant 0 : index
    %c0_92 = arith.constant 0 : index
    %143 = vector.load %arg1[%c1_90, %c0_91, %c0_92] : memref<2x8x32xf32, #tpu.memory_space<vmem>>, vector<1x8x32xf32>
    %144 = vector.shape_cast %143 : vector<1x8x32xf32> to vector<8x32xf32>
    %145 = arith.truncf %144 : vector<8x32xf32> to vector<8x32xbf16>
    %c1_93 = arith.constant 1 : index
    %c0_94 = arith.constant 0 : index
    %c0_95 = arith.constant 0 : index
    %146 = vector.load %arg2[%c1_93, %c0_94, %c0_95] : memref<2x16x16xf32, #tpu.memory_space<vmem>>, vector<1x16x16xf32>
    %147 = vector.shape_cast %146 : vector<1x16x16xf32> to vector<16x16xf32>
    %148 = arith.truncf %147 : vector<16x16xf32> to vector<16x16xbf16>
    %c1_96 = arith.constant 1 : index
    %c0_97 = arith.constant 0 : index
    %c0_98 = arith.constant 0 : index
    %149 = vector.load %arg3[%c1_96, %c0_97, %c0_98] : memref<2x1x16xf32, #tpu.memory_space<vmem>>, vector<1x1x16xf32>
    %150 = vector.shape_cast %149 : vector<1x1x16xf32> to vector<1x16xf32>
    %cst_99 = arith.constant 0.000000e+00 : f32
    %151 = vector.broadcast %cst_99 : f32 to vector<8x32xf32>
    %c0_100 = arith.constant 0 : index
    %c0_101 = arith.constant 0 : index
    %c0_102 = arith.constant 0 : index
    %152 = vector.load %arg4[%c0_100, %c0_101, %c0_102] : memref<4x32x8xbf16, #tpu.memory_space<vmem>>, vector<1x32x8xbf16>
    %153 = vector.shape_cast %152 : vector<1x32x8xbf16> to vector<32x8xbf16>
    %cst_103 = arith.constant dense<0.000000e+00> : vector<8x8xf32>
    %154 = tpu.matmul %145, %153, %cst_103 {dimension_numbers = #tpu.dot_dimension_numbers<[1], [0], [0], [1], [0, 0, 1, 1], [], []>} : vector<8x32xbf16>, vector<32x8xbf16>, vector<8x8xf32> -> vector<8x8xf32>
    %c0_104 = arith.constant 0 : index
    %c0_105 = arith.constant 0 : index
    %c0_106 = arith.constant 0 : index
    %155 = vector.load %arg5[%c0_104, %c0_105, %c0_106] : memref<4x16x8xbf16, #tpu.memory_space<vmem>>, vector<1x16x8xbf16>
    %156 = vector.shape_cast %155 : vector<1x16x8xbf16> to vector<16x8xbf16>
    %cst_107 = arith.constant dense<0.000000e+00> : vector<16x8xf32>
    %157 = tpu.matmul %148, %156, %cst_107 {dimension_numbers = #tpu.dot_dimension_numbers<[1], [0], [0], [1], [0, 0, 1, 1], [], []>} : vector<16x16xbf16>, vector<16x8xbf16>, vector<16x8xf32> -> vector<16x8xf32>
    %c0_108 = arith.constant 0 : index
    %c0_109 = arith.constant 0 : index
    %c0_110 = arith.constant 0 : index
    %158 = vector.load %arg6[%c0_108, %c0_109, %c0_110] : memref<4x16x8xbf16, #tpu.memory_space<vmem>>, vector<1x16x8xbf16>
    %159 = vector.shape_cast %158 : vector<1x16x8xbf16> to vector<16x8xbf16>
    %cst_111 = arith.constant dense<0.000000e+00> : vector<16x8xf32>
    %160 = tpu.matmul %148, %159, %cst_111 {dimension_numbers = #tpu.dot_dimension_numbers<[1], [0], [0], [1], [0, 0, 1, 1], [], []>} : vector<16x16xbf16>, vector<16x8xbf16>, vector<16x8xf32> -> vector<16x8xf32>
    %161 = arith.truncf %154 : vector<8x8xf32> to vector<8x8xbf16>
    %162 = arith.truncf %157 : vector<16x8xf32> to vector<16x8xbf16>
    %cst_112 = arith.constant dense<0.000000e+00> : vector<8x16xf32>
    %163 = tpu.matmul %161, %162, %cst_112 {dimension_numbers = #tpu.dot_dimension_numbers<[1], [1], [0], [0], [0, 0, 1, 0], [], []>} : vector<8x8xbf16>, vector<16x8xbf16>, vector<8x16xf32> -> vector<8x16xf32>
    %164 = vector.broadcast %150 : vector<1x16xf32> to vector<8x16xf32>
    %165 = arith.addf %163, %164 : vector<8x16xf32>
    %cst_113 = arith.constant dense<0xFF800000> : vector<8xf32>
    %166 = vector.multi_reduction <maximumf>, %165, %cst_113 [1] : vector<8x16xf32> to vector<8xf32>
    %167 = vector.shape_cast %166 : vector<8xf32> to vector<8x1xf32>
    %168 = vector.broadcast %167 : vector<8x1xf32> to vector<8x16xf32>
    %169 = arith.subf %165, %168 : vector<8x16xf32>
    %170 = math.exp %169 : vector<8x16xf32>
    %cst_114 = arith.constant dense<0.000000e+00> : vector<8xf32>
    %171 = vector.multi_reduction <add>, %170, %cst_114 [1] : vector<8x16xf32> to vector<8xf32>
    %172 = vector.shape_cast %171 : vector<8xf32> to vector<8x1xf32>
    %173 = tpu.reciprocal %172 {approx = true} : vector<8x1xf32> -> vector<8x1xf32>
    %174 = vector.broadcast %173 : vector<8x1xf32> to vector<8x16xf32>
    %175 = arith.mulf %170, %174 : vector<8x16xf32>
    %176 = arith.truncf %175 : vector<8x16xf32> to vector<8x16xbf16>
    %177 = arith.truncf %160 : vector<16x8xf32> to vector<16x8xbf16>
    %cst_115 = arith.constant dense<0.000000e+00> : vector<8x8xf32>
    %178 = tpu.matmul %176, %177, %cst_115 {dimension_numbers = #tpu.dot_dimension_numbers<[1], [0], [0], [1], [0, 0, 1, 1], [], []>} : vector<8x16xbf16>, vector<16x8xbf16>, vector<8x8xf32> -> vector<8x8xf32>
    %179 = arith.truncf %178 : vector<8x8xf32> to vector<8x8xbf16>
    %c0_116 = arith.constant 0 : index
    %c0_117 = arith.constant 0 : index
    %c0_118 = arith.constant 0 : index
    %180 = vector.load %arg7[%c0_116, %c0_117, %c0_118] : memref<4x8x32xbf16, #tpu.memory_space<vmem>>, vector<1x8x32xbf16>
    %181 = vector.shape_cast %180 : vector<1x8x32xbf16> to vector<8x32xbf16>
    %cst_119 = arith.constant dense<0.000000e+00> : vector<8x32xf32>
    %182 = tpu.matmul %179, %181, %cst_119 {dimension_numbers = #tpu.dot_dimension_numbers<[1], [0], [0], [1], [0, 0, 1, 1], [], []>} : vector<8x8xbf16>, vector<8x32xbf16>, vector<8x32xf32> -> vector<8x32xf32>
    %183 = arith.addf %151, %182 : vector<8x32xf32>
    %c1_120 = arith.constant 1 : index
    %c0_121 = arith.constant 0 : index
    %c0_122 = arith.constant 0 : index
    %184 = vector.load %arg4[%c1_120, %c0_121, %c0_122] : memref<4x32x8xbf16, #tpu.memory_space<vmem>>, vector<1x32x8xbf16>
    %185 = vector.shape_cast %184 : vector<1x32x8xbf16> to vector<32x8xbf16>
    %cst_123 = arith.constant dense<0.000000e+00> : vector<8x8xf32>
    %186 = tpu.matmul %145, %185, %cst_123 {dimension_numbers = #tpu.dot_dimension_numbers<[1], [0], [0], [1], [0, 0, 1, 1], [], []>} : vector<8x32xbf16>, vector<32x8xbf16>, vector<8x8xf32> -> vector<8x8xf32>
    %c1_124 = arith.constant 1 : index
    %c0_125 = arith.constant 0 : index
    %c0_126 = arith.constant 0 : index
    %187 = vector.load %arg5[%c1_124, %c0_125, %c0_126] : memref<4x16x8xbf16, #tpu.memory_space<vmem>>, vector<1x16x8xbf16>
    %188 = vector.shape_cast %187 : vector<1x16x8xbf16> to vector<16x8xbf16>
    %cst_127 = arith.constant dense<0.000000e+00> : vector<16x8xf32>
    %189 = tpu.matmul %148, %188, %cst_127 {dimension_numbers = #tpu.dot_dimension_numbers<[1], [0], [0], [1], [0, 0, 1, 1], [], []>} : vector<16x16xbf16>, vector<16x8xbf16>, vector<16x8xf32> -> vector<16x8xf32>
    %c1_128 = arith.constant 1 : index
    %c0_129 = arith.constant 0 : index
    %c0_130 = arith.constant 0 : index
    %190 = vector.load %arg6[%c1_128, %c0_129, %c0_130] : memref<4x16x8xbf16, #tpu.memory_space<vmem>>, vector<1x16x8xbf16>
    %191 = vector.shape_cast %190 : vector<1x16x8xbf16> to vector<16x8xbf16>
    %cst_131 = arith.constant dense<0.000000e+00> : vector<16x8xf32>
    %192 = tpu.matmul %148, %191, %cst_131 {dimension_numbers = #tpu.dot_dimension_numbers<[1], [0], [0], [1], [0, 0, 1, 1], [], []>} : vector<16x16xbf16>, vector<16x8xbf16>, vector<16x8xf32> -> vector<16x8xf32>
    %193 = arith.truncf %186 : vector<8x8xf32> to vector<8x8xbf16>
    %194 = arith.truncf %189 : vector<16x8xf32> to vector<16x8xbf16>
    %cst_132 = arith.constant dense<0.000000e+00> : vector<8x16xf32>
    %195 = tpu.matmul %193, %194, %cst_132 {dimension_numbers = #tpu.dot_dimension_numbers<[1], [1], [0], [0], [0, 0, 1, 0], [], []>} : vector<8x8xbf16>, vector<16x8xbf16>, vector<8x16xf32> -> vector<8x16xf32>
    %196 = vector.broadcast %150 : vector<1x16xf32> to vector<8x16xf32>
    %197 = arith.addf %195, %196 : vector<8x16xf32>
    %cst_133 = arith.constant dense<0xFF800000> : vector<8xf32>
    %198 = vector.multi_reduction <maximumf>, %197, %cst_133 [1] : vector<8x16xf32> to vector<8xf32>
    %199 = vector.shape_cast %198 : vector<8xf32> to vector<8x1xf32>
    %200 = vector.broadcast %199 : vector<8x1xf32> to vector<8x16xf32>
    %201 = arith.subf %197, %200 : vector<8x16xf32>
    %202 = math.exp %201 : vector<8x16xf32>
    %cst_134 = arith.constant dense<0.000000e+00> : vector<8xf32>
    %203 = vector.multi_reduction <add>, %202, %cst_134 [1] : vector<8x16xf32> to vector<8xf32>
    %204 = vector.shape_cast %203 : vector<8xf32> to vector<8x1xf32>
    %205 = tpu.reciprocal %204 {approx = true} : vector<8x1xf32> -> vector<8x1xf32>
    %206 = vector.broadcast %205 : vector<8x1xf32> to vector<8x16xf32>
    %207 = arith.mulf %202, %206 : vector<8x16xf32>
    %208 = arith.truncf %207 : vector<8x16xf32> to vector<8x16xbf16>
    %209 = arith.truncf %192 : vector<16x8xf32> to vector<16x8xbf16>
    %cst_135 = arith.constant dense<0.000000e+00> : vector<8x8xf32>
    %210 = tpu.matmul %208, %209, %cst_135 {dimension_numbers = #tpu.dot_dimension_numbers<[1], [0], [0], [1], [0, 0, 1, 1], [], []>} : vector<8x16xbf16>, vector<16x8xbf16>, vector<8x8xf32> -> vector<8x8xf32>
    %211 = arith.truncf %210 : vector<8x8xf32> to vector<8x8xbf16>
    %c1_136 = arith.constant 1 : index
    %c0_137 = arith.constant 0 : index
    %c0_138 = arith.constant 0 : index
    %212 = vector.load %arg7[%c1_136, %c0_137, %c0_138] : memref<4x8x32xbf16, #tpu.memory_space<vmem>>, vector<1x8x32xbf16>
    %213 = vector.shape_cast %212 : vector<1x8x32xbf16> to vector<8x32xbf16>
    %cst_139 = arith.constant dense<0.000000e+00> : vector<8x32xf32>
    %214 = tpu.matmul %211, %213, %cst_139 {dimension_numbers = #tpu.dot_dimension_numbers<[1], [0], [0], [1], [0, 0, 1, 1], [], []>} : vector<8x8xbf16>, vector<8x32xbf16>, vector<8x32xf32> -> vector<8x32xf32>
    %215 = arith.addf %183, %214 : vector<8x32xf32>
    %c2_140 = arith.constant 2 : index
    %c0_141 = arith.constant 0 : index
    %c0_142 = arith.constant 0 : index
    %216 = vector.load %arg4[%c2_140, %c0_141, %c0_142] : memref<4x32x8xbf16, #tpu.memory_space<vmem>>, vector<1x32x8xbf16>
    %217 = vector.shape_cast %216 : vector<1x32x8xbf16> to vector<32x8xbf16>
    %cst_143 = arith.constant dense<0.000000e+00> : vector<8x8xf32>
    %218 = tpu.matmul %145, %217, %cst_143 {dimension_numbers = #tpu.dot_dimension_numbers<[1], [0], [0], [1], [0, 0, 1, 1], [], []>} : vector<8x32xbf16>, vector<32x8xbf16>, vector<8x8xf32> -> vector<8x8xf32>
    %c2_144 = arith.constant 2 : index
    %c0_145 = arith.constant 0 : index
    %c0_146 = arith.constant 0 : index
    %219 = vector.load %arg5[%c2_144, %c0_145, %c0_146] : memref<4x16x8xbf16, #tpu.memory_space<vmem>>, vector<1x16x8xbf16>
    %220 = vector.shape_cast %219 : vector<1x16x8xbf16> to vector<16x8xbf16>
    %cst_147 = arith.constant dense<0.000000e+00> : vector<16x8xf32>
    %221 = tpu.matmul %148, %220, %cst_147 {dimension_numbers = #tpu.dot_dimension_numbers<[1], [0], [0], [1], [0, 0, 1, 1], [], []>} : vector<16x16xbf16>, vector<16x8xbf16>, vector<16x8xf32> -> vector<16x8xf32>
    %c2_148 = arith.constant 2 : index
    %c0_149 = arith.constant 0 : index
    %c0_150 = arith.constant 0 : index
    %222 = vector.load %arg6[%c2_148, %c0_149, %c0_150] : memref<4x16x8xbf16, #tpu.memory_space<vmem>>, vector<1x16x8xbf16>
    %223 = vector.shape_cast %222 : vector<1x16x8xbf16> to vector<16x8xbf16>
    %cst_151 = arith.constant dense<0.000000e+00> : vector<16x8xf32>
    %224 = tpu.matmul %148, %223, %cst_151 {dimension_numbers = #tpu.dot_dimension_numbers<[1], [0], [0], [1], [0, 0, 1, 1], [], []>} : vector<16x16xbf16>, vector<16x8xbf16>, vector<16x8xf32> -> vector<16x8xf32>
    %225 = arith.truncf %218 : vector<8x8xf32> to vector<8x8xbf16>
    %226 = arith.truncf %221 : vector<16x8xf32> to vector<16x8xbf16>
    %cst_152 = arith.constant dense<0.000000e+00> : vector<8x16xf32>
    %227 = tpu.matmul %225, %226, %cst_152 {dimension_numbers = #tpu.dot_dimension_numbers<[1], [1], [0], [0], [0, 0, 1, 0], [], []>} : vector<8x8xbf16>, vector<16x8xbf16>, vector<8x16xf32> -> vector<8x16xf32>
    %228 = vector.broadcast %150 : vector<1x16xf32> to vector<8x16xf32>
    %229 = arith.addf %227, %228 : vector<8x16xf32>
    %cst_153 = arith.constant dense<0xFF800000> : vector<8xf32>
    %230 = vector.multi_reduction <maximumf>, %229, %cst_153 [1] : vector<8x16xf32> to vector<8xf32>
    %231 = vector.shape_cast %230 : vector<8xf32> to vector<8x1xf32>
    %232 = vector.broadcast %231 : vector<8x1xf32> to vector<8x16xf32>
    %233 = arith.subf %229, %232 : vector<8x16xf32>
    %234 = math.exp %233 : vector<8x16xf32>
    %cst_154 = arith.constant dense<0.000000e+00> : vector<8xf32>
    %235 = vector.multi_reduction <add>, %234, %cst_154 [1] : vector<8x16xf32> to vector<8xf32>
    %236 = vector.shape_cast %235 : vector<8xf32> to vector<8x1xf32>
    %237 = tpu.reciprocal %236 {approx = true} : vector<8x1xf32> -> vector<8x1xf32>
    %238 = vector.broadcast %237 : vector<8x1xf32> to vector<8x16xf32>
    %239 = arith.mulf %234, %238 : vector<8x16xf32>
    %240 = arith.truncf %239 : vector<8x16xf32> to vector<8x16xbf16>
    %241 = arith.truncf %224 : vector<16x8xf32> to vector<16x8xbf16>
    %cst_155 = arith.constant dense<0.000000e+00> : vector<8x8xf32>
    %242 = tpu.matmul %240, %241, %cst_155 {dimension_numbers = #tpu.dot_dimension_numbers<[1], [0], [0], [1], [0, 0, 1, 1], [], []>} : vector<8x16xbf16>, vector<16x8xbf16>, vector<8x8xf32> -> vector<8x8xf32>
    %243 = arith.truncf %242 : vector<8x8xf32> to vector<8x8xbf16>
    %c2_156 = arith.constant 2 : index
    %c0_157 = arith.constant 0 : index
    %c0_158 = arith.constant 0 : index
    %244 = vector.load %arg7[%c2_156, %c0_157, %c0_158] : memref<4x8x32xbf16, #tpu.memory_space<vmem>>, vector<1x8x32xbf16>
    %245 = vector.shape_cast %244 : vector<1x8x32xbf16> to vector<8x32xbf16>
    %cst_159 = arith.constant dense<0.000000e+00> : vector<8x32xf32>
    %246 = tpu.matmul %243, %245, %cst_159 {dimension_numbers = #tpu.dot_dimension_numbers<[1], [0], [0], [1], [0, 0, 1, 1], [], []>} : vector<8x8xbf16>, vector<8x32xbf16>, vector<8x32xf32> -> vector<8x32xf32>
    %247 = arith.addf %215, %246 : vector<8x32xf32>
    %c3_160 = arith.constant 3 : index
    %c0_161 = arith.constant 0 : index
    %c0_162 = arith.constant 0 : index
    %248 = vector.load %arg4[%c3_160, %c0_161, %c0_162] : memref<4x32x8xbf16, #tpu.memory_space<vmem>>, vector<1x32x8xbf16>
    %249 = vector.shape_cast %248 : vector<1x32x8xbf16> to vector<32x8xbf16>
    %cst_163 = arith.constant dense<0.000000e+00> : vector<8x8xf32>
    %250 = tpu.matmul %145, %249, %cst_163 {dimension_numbers = #tpu.dot_dimension_numbers<[1], [0], [0], [1], [0, 0, 1, 1], [], []>} : vector<8x32xbf16>, vector<32x8xbf16>, vector<8x8xf32> -> vector<8x8xf32>
    %c3_164 = arith.constant 3 : index
    %c0_165 = arith.constant 0 : index
    %c0_166 = arith.constant 0 : index
    %251 = vector.load %arg5[%c3_164, %c0_165, %c0_166] : memref<4x16x8xbf16, #tpu.memory_space<vmem>>, vector<1x16x8xbf16>
    %252 = vector.shape_cast %251 : vector<1x16x8xbf16> to vector<16x8xbf16>
    %cst_167 = arith.constant dense<0.000000e+00> : vector<16x8xf32>
    %253 = tpu.matmul %148, %252, %cst_167 {dimension_numbers = #tpu.dot_dimension_numbers<[1], [0], [0], [1], [0, 0, 1, 1], [], []>} : vector<16x16xbf16>, vector<16x8xbf16>, vector<16x8xf32> -> vector<16x8xf32>
    %c3_168 = arith.constant 3 : index
    %c0_169 = arith.constant 0 : index
    %c0_170 = arith.constant 0 : index
    %254 = vector.load %arg6[%c3_168, %c0_169, %c0_170] : memref<4x16x8xbf16, #tpu.memory_space<vmem>>, vector<1x16x8xbf16>
    %255 = vector.shape_cast %254 : vector<1x16x8xbf16> to vector<16x8xbf16>
    %cst_171 = arith.constant dense<0.000000e+00> : vector<16x8xf32>
    %256 = tpu.matmul %148, %255, %cst_171 {dimension_numbers = #tpu.dot_dimension_numbers<[1], [0], [0], [1], [0, 0, 1, 1], [], []>} : vector<16x16xbf16>, vector<16x8xbf16>, vector<16x8xf32> -> vector<16x8xf32>
    %257 = arith.truncf %250 : vector<8x8xf32> to vector<8x8xbf16>
    %258 = arith.truncf %253 : vector<16x8xf32> to vector<16x8xbf16>
    %cst_172 = arith.constant dense<0.000000e+00> : vector<8x16xf32>
    %259 = tpu.matmul %257, %258, %cst_172 {dimension_numbers = #tpu.dot_dimension_numbers<[1], [1], [0], [0], [0, 0, 1, 0], [], []>} : vector<8x8xbf16>, vector<16x8xbf16>, vector<8x16xf32> -> vector<8x16xf32>
    %260 = vector.broadcast %150 : vector<1x16xf32> to vector<8x16xf32>
    %261 = arith.addf %259, %260 : vector<8x16xf32>
    %cst_173 = arith.constant dense<0xFF800000> : vector<8xf32>
    %262 = vector.multi_reduction <maximumf>, %261, %cst_173 [1] : vector<8x16xf32> to vector<8xf32>
    %263 = vector.shape_cast %262 : vector<8xf32> to vector<8x1xf32>
    %264 = vector.broadcast %263 : vector<8x1xf32> to vector<8x16xf32>
    %265 = arith.subf %261, %264 : vector<8x16xf32>
    %266 = math.exp %265 : vector<8x16xf32>
    %cst_174 = arith.constant dense<0.000000e+00> : vector<8xf32>
    %267 = vector.multi_reduction <add>, %266, %cst_174 [1] : vector<8x16xf32> to vector<8xf32>
    %268 = vector.shape_cast %267 : vector<8xf32> to vector<8x1xf32>
    %269 = tpu.reciprocal %268 {approx = true} : vector<8x1xf32> -> vector<8x1xf32>
    %270 = vector.broadcast %269 : vector<8x1xf32> to vector<8x16xf32>
    %271 = arith.mulf %266, %270 : vector<8x16xf32>
    %272 = arith.truncf %271 : vector<8x16xf32> to vector<8x16xbf16>
    %273 = arith.truncf %256 : vector<16x8xf32> to vector<16x8xbf16>
    %cst_175 = arith.constant dense<0.000000e+00> : vector<8x8xf32>
    %274 = tpu.matmul %272, %273, %cst_175 {dimension_numbers = #tpu.dot_dimension_numbers<[1], [0], [0], [1], [0, 0, 1, 1], [], []>} : vector<8x16xbf16>, vector<16x8xbf16>, vector<8x8xf32> -> vector<8x8xf32>
    %275 = arith.truncf %274 : vector<8x8xf32> to vector<8x8xbf16>
    %c3_176 = arith.constant 3 : index
    %c0_177 = arith.constant 0 : index
    %c0_178 = arith.constant 0 : index
    %276 = vector.load %arg7[%c3_176, %c0_177, %c0_178] : memref<4x8x32xbf16, #tpu.memory_space<vmem>>, vector<1x8x32xbf16>
    %277 = vector.shape_cast %276 : vector<1x8x32xbf16> to vector<8x32xbf16>
    %cst_179 = arith.constant dense<0.000000e+00> : vector<8x32xf32>
    %278 = tpu.matmul %275, %277, %cst_179 {dimension_numbers = #tpu.dot_dimension_numbers<[1], [0], [0], [1], [0, 0, 1, 1], [], []>} : vector<8x8xbf16>, vector<8x32xbf16>, vector<8x32xf32> -> vector<8x32xf32>
    %279 = arith.addf %247, %278 : vector<8x32xf32>
    %c0_180 = arith.constant 0 : index
    %c0_181 = arith.constant 0 : index
    %280 = vector.load %arg8[%c0_180, %c0_181] : memref<1x32xf32, #tpu.memory_space<vmem>>, vector<1x32xf32>
    %281 = vector.broadcast %280 : vector<1x32xf32> to vector<8x32xf32>
    %282 = arith.addf %279, %281 : vector<8x32xf32>
    %c1_182 = arith.constant 1 : index
    %c0_183 = arith.constant 0 : index
    %c0_184 = arith.constant 0 : index
    %283 = vector.load %arg9[%c1_182, %c0_183, %c0_184] : memref<2x8x32xf32, #tpu.memory_space<vmem>>, vector<1x8x32xf32>
    %284 = vector.shape_cast %283 : vector<1x8x32xf32> to vector<8x32xf32>
    %285 = vector.shape_cast %282 : vector<8x32xf32> to vector<1x8x32xf32>
    tpu.vector_store %arg9[%c1_182, %c0_183, %c0_184], %285 {strides = array<i32>} : memref<2x8x32xf32, #tpu.memory_space<vmem>>, vector<1x8x32xf32>,
    return
  }
  func.func @transform_0(%arg0: i32) -> (i32, i32, i32) {
    %c0_i32 = arith.constant 0 : i32
    %c0_i32_0 = arith.constant 0 : i32
    %c0_i32_1 = arith.constant 0 : i32
    return %c0_i32, %arg0, %c0_i32_0 : i32, i32, i32
  }
  func.func @transform_1(%arg0: i32) -> (i32, i32, i32) {
    %c0_i32 = arith.constant 0 : i32
    %c0_i32_0 = arith.constant 0 : i32
    %c0_i32_1 = arith.constant 0 : i32
    %c0_i32_2 = arith.constant 0 : i32
    return %c0_i32, %c0_i32_0, %c0_i32_1 : i32, i32, i32
  }
  func.func @transform_2(%arg0: i32) -> (i32, i32, i32) {
    %c0_i32 = arith.constant 0 : i32
    %c0_i32_0 = arith.constant 0 : i32
    %c0_i32_1 = arith.constant 0 : i32
    %c0_i32_2 = arith.constant 0 : i32
    return %c0_i32, %c0_i32_0, %c0_i32_1 : i32, i32, i32
  }
  func.func @transform_3(%arg0: i32) -> (i32, i32, i32) {
    %c0_i32 = arith.constant 0 : i32
    %c0_i32_0 = arith.constant 0 : i32
    %c0_i32_1 = arith.constant 0 : i32
    %c0_i32_2 = arith.constant 0 : i32
    return %c0_i32, %c0_i32_0, %c0_i32_1 : i32, i32, i32
  }
  func.func @transform_4(%arg0: i32) -> (i32, i32, i32) {
    %c0_i32 = arith.constant 0 : i32
    %c0_i32_0 = arith.constant 0 : i32
    %c0_i32_1 = arith.constant 0 : i32
    %c0_i32_2 = arith.constant 0 : i32
    return %c0_i32, %c0_i32_0, %c0_i32_1 : i32, i32, i32
  }
  func.func @transform_5(%arg0: i32) -> (i32, i32, i32) {
    %c0_i32 = arith.constant 0 : i32
    %c0_i32_0 = arith.constant 0 : i32
    %c0_i32_1 = arith.constant 0 : i32
    %c0_i32_2 = arith.constant 0 : i32
    return %c0_i32, %c0_i32_0, %c0_i32_1 : i32, i32, i32
  }
  func.func @transform_6(%arg0: i32) -> (i32, i32, i32) {
    %c0_i32 = arith.constant 0 : i32
    %c0_i32_0 = arith.constant 0 : i32
    %c0_i32_1 = arith.constant 0 : i32
    %c0_i32_2 = arith.constant 0 : i32
    return %c0_i32, %c0_i32_0, %c0_i32_1 : i32, i32, i32
  }
  func.func @transform_7(%arg0: i32) -> (i32, i32) {
    %c0_i32 = arith.constant 0 : i32
    %c0_i32_0 = arith.constant 0 : i32
    %c0_i32_1 = arith.constant 0 : i32
    return %c0_i32, %c0_i32_0 : i32, i32
  }
  func.func @transform_8(%arg0: i32) -> (i32, i32, i32) {
    %c0_i32 = arith.constant 0 : i32
    %c0_i32_0 = arith.constant 0 : i32
    %c0_i32_1 = arith.constant 0 : i32
    return %c0_i32, %arg0, %c0_i32_0 : i32, i32, i32
  }
}

</mosaic_0001>

<bundles_post_ra>
// kernel: tpu_custom_call.1
= control target key start
LH: loop header
LB: loop body
LE: loop exit
PB: predicated region body
PF: predicated region fallthrough
CT: control target
= control target key end

     0   :  { %vm78_vm0 = vcmask 130048   ;;  %s1931_s0 = inlined_call_operand.vmem [shape: f32[2,8,32], index: 0, kind: input, shape index: {}]   ;;  %s1932_s1 = inlined_call_operand.vmem [shape: f32[2,16,16], index: 1, kind: input, shape index: {}]   ;;  %s1933_s2 = inlined_call_operand.vmem [shape: f32[2,1,16], index: 2, kind: input, shape index: {}]   ;;  %s1934_s3 = inlined_call_operand.vmem [shape: bf16[4,32,8], index: 3, kind: input, shape index: {}]   ;;  %s1935_s4 = inlined_call_operand.vmem [shape: bf16[4,16,8], index: 4, kind: input, shape index: {}]   ;;  %s1936_s5 = inlined_call_operand.vmem [shape: bf16[4,16,8], index: 5, kind: input, shape index: {}]   ;;  %s1937_s6 = inlined_call_operand.vmem [shape: bf16[4,8,32], index: 6, kind: input, shape index: {}]   ;;  %s1938_s7 = inlined_call_operand.vmem [shape: f32[1,32], index: 7, kind: input, shape index: {}]   ;;  %s1939_s8 = inlined_call_operand.hbm [shape: f32[2,8,32], index: 8, kind: output, shape index: {}]  }
   0x1   :  { %v1503_v0 = vld [vmem:[%s1935_s4] sm:$0xff]  ;;  %v34_v2 = vld [vmem:[%s1932_s1 + $0x8] sm:$0xff] }
   0x2   :  { %v33_v1 = vld [vmem:[%s1932_s1] sm:$0xff]  ;;  %v1502_v4 = vld [vmem:[%s1934_s3 + $0x8] sm:$0xff]  ;;  %89 = vmatpush.bf16.msra.mxu1 %v1503_v0 }
   0x3   :  { %v1655_v3 = vpack.c.bf16 %v34_v2, %v33_v1  ;;  %v1501_v5 = vld [vmem:[%s1934_s3] sm:$0xff]  ;;  %63 = vmatpush.bf16.msra.mxu0 %v1502_v4 }
   0x4   :  { %v31_v6 = vld [vmem:[%s1931_s0] sm:$0xff] }
   0x5   :  { %13 = vsyncpa [#allocation3], 0  ;;  %1280 = vmatmul.msk.bf16.vlgmr.msra.gmra.mxu1 %vm78_vm0, %v1655_v3  ;;  %v1668_v7 = vpack.c.bf16 %v31_v6, %v31_v6  ;;  %vm53_vm1 = vcmask 261120   ;;  %vm123_vm2 = vcmask 64512   ;;  %v1504_v15 = vld [vmem:[%s1936_s5] sm:$0xff]  ;;  %v1507_v21 = vld [vmem:[%s1935_s4 + $0x8] sm:$0xff] }
   0x6   :  { %111 = vmatpush.bf16.msra.mxu2 %v1504_v15  ;;  %v1682_v16 = vld [vmem:[%s1933_s2] ss:$0 sm:$0xff]  ;;  %v1506_v22 = vld [vmem:[%s1934_s3 + $0x18] sm:$0xff]  ;;  %v1505_v23 = vld [vmem:[%s1934_s3 + $0x10] sm:$0xff]  ;;  %vm306_vm3 = vcmask 1043456   ;;  %s1255_s11 = sshll.u32 %s1939_s8, 4  ;;  %s1256_s11 = int_to_ptr.hbm [resolvable:$true] %s1255_s11 }
   0x7   :  { %64 = vmatpush.bf16.msra.mxu0 %v1501_v5  ;;  %v1508_v38 = vld [vmem:[%s1936_s5 + $0x8] sm:$0xff]  ;;  %v173_v44 = vld [vmem:[%s1937_s6] sm:$0xf]  ;;  %v1511_v63 = vld [vmem:[%s1935_s4 + $0x10] sm:$0xff]  ;;  %s1599_s12 = smov 128   ;;  %s1600_s13 = smov 8  }
   0x8   :  { %v327_v45 = vsel %vm306_vm3, %v173_v44, 0  ;;  %v1510_v0 = vld [vmem:[%s1934_s3 + $0x28] sm:$0xff]  ;;  %v1509_v1 = vld [vmem:[%s1934_s3 + $0x20] sm:$0xff] }
   0x9   :  { %1285 = vmatmul.msk.bf16.vlgmr.msra.gmra.mxu2 %vm78_vm0, %v1655_v3 }
   0xa   :  { %1275 = vmatmul.msk.bf16.vlgmr.msra.gmra.mxu0 %vm53_vm1, %v1668_v7  ;;  %197 = vmatpush.bf16.msrb.mxu2 %v1506_v22 }
   0xb   :  { %220 = vmatpush.bf16.msrb.mxu0 %v1507_v21 }
   0xe   :  { %198 = vmatpush.bf16.msrb.mxu2 %v1505_v23  ;;  %v1512_v23 = vld [vmem:[%s1936_s5 + $0x10] sm:$0xff] }
  0x19   :  { %1300 = vmatmul.msk.bf16.vlgmr.msrb.gmra.mxu2 %vm53_vm1, %v1668_v7 }
  0x1a   :  { %1307 = vmatmul.msk.bf16.vlgmr.msrb.gmra.mxu0 %vm78_vm0, %v1655_v3 }
  0x82   :  { %v91_v8 = vpop.f32.mrf.mxu1 }
  0x87   :  { %v66_v9 = vpop.f32.mrf.mxu0 }
  0x88   :  { %v118_v14 = vpack.c.bf16 %v66_v9, %v66_v9 }
  0x8a   :  { %v93_v10 = vpop.f32.mrf.mxu1 }
  0x8b   :  { %v119_v11 = vpack.c.bf16 %v93_v10, %v91_v8  ;;  %v1317_v8 = vld [vmem:[%s1937_s6 + $0x4] sm:$0xf] }
  0x8c   :  { %v113_v24 = vpop.f32.mrf.mxu2  ;;  %v308_v9 = vsel %vm306_vm3, %v1317_v8, 0 }
  0x8d   :  { %v128_v12 = vsel %vm123_vm2, %v119_v11, 0  ;;  %317 = vmatpush.bf16.msra.mxu0 %v308_v9 }
  0x8e   :  { %137 = vmatpush.bf16.xpose.msra.mxu3 %v128_v12 }
  0x8f   :  { %v68_v13 = vpop.f32.mrf.mxu0 }
  0x91   :  { %411 = vmatpush.bf16.msrb.mxu0 %v1512_v23 }
  0x94   :  { %v115_v27 = vpop.f32.mrf.mxu2 }
  0x95   :  { %1286 = vmatmul.msk.bf16.vlgmr.msra.gmra.mxu3 %vm123_vm2, %v118_v14  ;;  %v155_v28 = vpack.c.bf16 %v115_v27, %v113_v24 }
  0x96   :  { %243 = vmatpush.bf16.msrb.mxu3 %v1508_v38  ;;  %v1349_v38 = vld [vmem:[%s1937_s6 + $0x8] sm:$0xf] }
  0x97   :  { %166 = vmatpush.bf16.msrb.mxu1 %v155_v28  ;;  %v222_v32 = vpop.f32.mrf.mxu0  ;;  %v1515_v28 = vld [vmem:[%s1935_s4 + $0x18] sm:$0xff] }
  0x9a   :  { %336 = vmatpush.bf16.msra.mxu3 %v327_v45 }
  0x9c   :  { %v200_v36 = vpop.f32.mrf.mxu2 }
  0x9d   :  { %v250_v43 = vpack.c.bf16 %v200_v36, %v200_v36 }
  0x9f   :  { %v224_v33 = vpop.f32.mrf.mxu0 }
  0xa0   :  { %v251_v34 = vpack.c.bf16 %v224_v33, %v222_v32 }
  0xa2   :  { %v256_v35 = vsel %vm123_vm2, %v251_v34, 0 }
  0xa3   :  { %265 = vmatpush.bf16.xpose.msra.mxu1 %v256_v35 }
  0xa4   :  { %v202_v37 = vpop.f32.mrf.mxu2 }
  0xa5   :  { %1314 = vmatmul.msk.bf16.vlgmr.msrb.gmra.mxu3 %vm78_vm0, %v1655_v3  ;;  %v1514_v37 = vld [vmem:[%s1934_s3 + $0x38] sm:$0xff] }
 0x118   :  { %v139_v17 = vpop.f32.mrf.mxu3 }
 0x119   :  { %v140_v18 = vadd.f32 %v1682_v16, %v139_v17 }
 0x11b   :  { %v143_v19 = vsel %vm78_vm0, %v140_v18, -inf }
 0x11c   :  { %144 = vmax.xlane.f32.xlu0 %v143_v19 }
 0x120   :  { %v141_v20 = vpop.f32.mrf.mxu3 }
 0x128   :  { %v245_v46 = vpop.f32.mrf.mxu3 }
 0x130   :  { %v247_v49 = vpop.f32.mrf.mxu3 }
 0x131   :  { %v283_v50 = vpack.c.bf16 %v247_v49, %v245_v46 }
 0x133   :  { %294 = vmatpush.bf16.msra.mxu2 %v283_v50 }
 0x137   :  { %388 = vmatpush.bf16.msrb.mxu2 %v1511_v63 }
 0x18f   :  { %v145_v25 = vpop.xlane.xlu0 %144 }
 0x190   :  { %v146_v26 = vsub.f32 %v140_v18, %v145_v25 }
 0x192   :  { %v147_v29 = vmul.f32 1.442695, %v146_v26 }
 0x194   :  { %1540 = vpow2.f32 %v147_v29 }
 0x19a   :  { %v1541_v30 = vpop.eup %1540 }
 0x19b   :  { %v149_v31 = vsel %vm78_vm0, %v1541_v30, 0.0 }
 0x19c   :  { %150 = vadd.xlane.f32.xlu0 %v149_v31 }
 0x20f   :  { %v151_v39 = vpop.xlane.xlu0 %150 }
 0x210   :  { %1542 = vrcp.f32 %v151_v39  ;;  %v1513_v39 = vld [vmem:[%s1934_s3 + $0x30] sm:$0xff] }
 0x216   :  { %v1543_v40 = vpop.eup %1542 }
 0x217   :  { %v153_v41 = vmul.f32 %v1543_v40, %v1541_v30  ;;  %v475_v40 = vsel %vm306_vm3, %v1349_v38, 0  ;;  %v1823_v38 = vld [vmem:[%s1933_s2 + $0x1] ss:$0 sm:$0xff] }
 0x219   :  { %v154_v42 = vpack.c.bf16 %v153_v41, %v153_v41 }
 0x21b   :  { %1287 = vmatmul.msk.bf16.vlgmr.msrb.gmra.mxu1 %vm78_vm0, %v154_v42 }
 0x21c   :  { %365 = vmatpush.bf16.msrb.mxu1 %v1510_v0  ;;  %v1519_v0 = vld [vmem:[%s1935_s4] sm:$0xff] }
 0x220   :  { %366 = vmatpush.bf16.msrb.mxu1 %v1509_v1 }
 0x22b   :  { %1315 = vmatmul.msk.bf16.vlgmr.msra.gmra.mxu1 %vm123_vm2, %v250_v43 }
 0x23b   :  { %1332 = vmatmul.msk.bf16.vlgmr.msrb.gmra.mxu1 %vm53_vm1, %v1668_v7 }
 0x298   :  { %v168_v47 = vpop.f32.mrf.mxu1 }
 0x299   :  { %v172_v48 = vpack.c.bf16 %v168_v47, %v168_v47 }
 0x29b   :  { %1319 = vmatmul.msk.bf16.vlgmr.msra.gmra.mxu3 %vm123_vm2, %v172_v48 }
 0x2a0   :  { %v170_v51 = vpop.f32.mrf.mxu1 }
 0x2a8   :  { %v267_v52 = vpop.f32.mrf.mxu1 }
 0x2a9   :  { %v268_v53 = vadd.f32 %v1682_v16, %v267_v52 }
 0x2ab   :  { %v271_v54 = vsel %vm78_vm0, %v268_v53, -inf }
 0x2ac   :  { %272 = vmax.xlane.f32.xlu1 %v271_v54  ;;  %v1516_v54 = vld [vmem:[%s1936_s5 + $0x18] sm:$0xff] }
 0x2b0   :  { %v269_v55 = vpop.f32.mrf.mxu1 }
 0x2b8   :  { %v368_v10 = vpop.f32.mrf.mxu1 }
 0x2b9   :  { %v418_v20 = vpack.c.bf16 %v368_v10, %v368_v10 }
 0x2c0   :  { %v370_v11 = vpop.f32.mrf.mxu1 }
 0x2c1   :  { %v1518_v11 = vld [vmem:[%s1934_s3 + $0x8] sm:$0xff] }
 0x31e   :  { %v1715_v56 = vpop.f32.mrf.mxu3 }
 0x31f   :  { %v273_v57 = vpop.xlane.xlu1 %272 }
 0x320   :  { %v274_v58 = vsub.f32 %v268_v53, %v273_v57 }
 0x322   :  { %v275_v59 = vmul.f32 1.442695, %v274_v58 }
 0x324   :  { %1544 = vpow2.f32 %v275_v59 }
 0x326   :  { %v340_v60 = vpop.f32.mrf.mxu3 }
 0x32a   :  { %v1545_v61 = vpop.eup %1544 }
 0x32b   :  { %v277_v62 = vsel %vm78_vm0, %v1545_v61, 0.0 }
 0x32c   :  { %278 = vadd.xlane.f32.xlu1 %v277_v62 }
 0x39f   :  { %v279_v2 = vpop.xlane.xlu1 %278 }
 0x3a0   :  { %1546 = vrcp.f32 %v279_v2 }
 0x3a6   :  { %v1547_v4 = vpop.eup %1546 }
 0x3a7   :  { %v281_v5 = vmul.f32 %v1547_v4, %v1545_v61 }
 0x3a9   :  { %v282_v6 = vpack.c.bf16 %v281_v5, %v281_v5 }
 0x3ab   :  { %1316 = vmatmul.msk.bf16.vlgmr.msra.gmra.mxu2 %vm78_vm0, %v282_v6 }
 0x3ac   :  { %484 = vmatpush.bf16.msra.mxu2 %v475_v40 }
 0x3bb   :  { %1339 = vmatmul.msk.bf16.vlgmr.msrb.gmra.mxu2 %vm78_vm0, %v1655_v3 }
 0x42e   :  { %v296_v12 = vpop.f32.mrf.mxu2 }
 0x42f   :  { %v300_v13 = vpack.c.bf16 %v296_v12, %v296_v12  ;;  %v1380_v12 = vld [vmem:[%s1937_s6 + $0xc] sm:$0xf] }
 0x431   :  { %1318 = vmatmul.msk.bf16.vlgmr.msra.gmra.mxu0 %vm123_vm2, %v300_v13  ;;  %v1517_v13 = vld [vmem:[%s1934_s3] sm:$0xff] }
 0x432   :  { %514 = vmatpush.bf16.msra.mxu0 %v1514_v37 }
 0x436   :  { %v298_v14 = vpop.f32.mrf.mxu2  ;;  %515 = vmatpush.bf16.msra.mxu0 %v1513_v39 }
 0x437   :  { %v1382_v14 = vld [vmem:[%s1931_s0 + $0x8] sm:$0xff] }
 0x43e   :  { %v390_v15 = vpop.f32.mrf.mxu2 }
 0x441   :  { %1346 = vmatmul.msk.bf16.vlgmr.msrb.gmra.mxu0 %vm78_vm0, %v1655_v3 }
 0x446   :  { %v392_v17 = vpop.f32.mrf.mxu2 }
 0x447   :  { %v419_v18 = vpack.c.bf16 %v392_v17, %v390_v15  ;;  %v624_v15 = vsel %vm306_vm3, %v1380_v12, 0  ;;  %v1803_v17 = vpack.c.bf16 %v1382_v14, %v1382_v14 }
 0x449   :  { %v424_v19 = vsel %vm123_vm2, %v419_v18, 0 }
 0x44a   :  { %433 = vmatpush.bf16.xpose.msrb.mxu3 %v424_v19 }
 0x451   :  { %1347 = vmatmul.msk.bf16.vlgmr.msrb.gmra.mxu3 %vm123_vm2, %v418_v20  ;;  %1363 = vmatmul.msk.bf16.vlgmr.msra.gmra.mxu0 %vm53_vm1, %v1668_v7 }
 0x452   :  { %537 = vmatpush.bf16.msra.mxu3 %v1515_v28 }
 0x456   :  { %633 = vmatpush.bf16.msrb.mxu3 %v624_v15 }
 0x461   :  { %1370 = vmatmul.msk.bf16.vlgmr.msra.gmra.mxu3 %vm78_vm0, %v1655_v3 }
 0x4ae   :  { %v319_v21 = vpop.f32.mrf.mxu0 }
 0x4af   :  { %v339_v55 = vadd.f32 %v1715_v56, %v319_v21  ;;  %v1384_v56 = vld [vmem:[%s1932_s1 + $0x18] sm:$0xff] }
 0x4b6   :  { %v321_v22 = vpop.f32.mrf.mxu0 }
 0x4be   :  { %v413_v29 = vpop.f32.mrf.mxu0 }
 0x4c6   :  { %v415_v30 = vpop.f32.mrf.mxu0 }
 0x4c7   :  { %v451_v31 = vpack.c.bf16 %v415_v30, %v413_v29 }
 0x4c9   :  { %462 = vmatpush.bf16.msra.mxu1 %v451_v31 }
 0x4cd   :  { %560 = vmatpush.bf16.msrb.mxu1 %v1516_v54 }
 0x4ce   :  { %v517_v49 = vpop.f32.mrf.mxu0 }
 0x4cf   :  { %v567_v53 = vpack.c.bf16 %v517_v49, %v517_v49 }
 0x4d4   :  { %v435_v24 = vpop.f32.mrf.mxu3 }
 0x4d5   :  { %v436_v25 = vadd.f32 %v1682_v16, %v435_v24 }
 0x4d6   :  { %v519_v50 = vpop.f32.mrf.mxu0 }
 0x4d7   :  { %v439_v26 = vsel %vm78_vm0, %v436_v25, -inf }
 0x4d8   :  { %440 = vmax.xlane.f32.xlu2 %v439_v26 }
 0x4dc   :  { %v437_v27 = vpop.f32.mrf.mxu3 }
 0x4e4   :  { %v539_v45 = vpop.f32.mrf.mxu3 }
 0x4ec   :  { %v541_v46 = vpop.f32.mrf.mxu3 }
 0x4ed   :  { %v568_v47 = vpack.c.bf16 %v541_v46, %v539_v45  ;;  %v1521_v45 = vld [vmem:[%s1934_s3 + $0x10] sm:$0xff] }
 0x4ef   :  { %v573_v48 = vsel %vm123_vm2, %v568_v47, 0 }
 0x4f0   :  { %582 = vmatpush.bf16.xpose.msrb.mxu2 %v573_v48 }
 0x54b   :  { %v441_v32 = vpop.xlane.xlu2 %440 }
 0x54c   :  { %v442_v33 = vsub.f32 %v436_v25, %v441_v32  ;;  %v1520_v32 = vld [vmem:[%s1936_s5] sm:$0xff] }
 0x54e   :  { %v443_v34 = vmul.f32 1.442695, %v442_v33  ;;  %v1537_v33 = vld [vmem:[%s1938_s7] ss:$0 sm:$0xff] }
 0x550   :  { %1548 = vpow2.f32 %v443_v34 }
 0x556   :  { %v1549_v35 = vpop.eup %1548 }
 0x557   :  { %v445_v36 = vsel %vm78_vm0, %v1549_v35, 0.0 }
 0x558   :  { %446 = vadd.xlane.f32.xlu2 %v445_v36 }
 0x5cb   :  { %v447_v41 = vpop.xlane.xlu2 %446 }
 0x5cc   :  { %1550 = vrcp.f32 %v447_v41 }
 0x5d2   :  { %v1551_v42 = vpop.eup %1550 }
 0x5d3   :  { %v449_v43 = vmul.f32 %v1551_v42, %v1549_v35 }
 0x5d5   :  { %v450_v44 = vpack.c.bf16 %v449_v43, %v449_v43  ;;  %v1523_v43 = vld [vmem:[%s1935_s4 + $0x8] sm:$0xff] }
 0x5d7   :  { %1348 = vmatmul.msk.bf16.vlgmr.msra.gmra.mxu1 %vm78_vm0, %v450_v44  ;;  %v1522_v44 = vld [vmem:[%s1934_s3 + $0x18] sm:$0xff] }
 0x5d8   :  { %680 = vmatpush.bf16.msra.mxu1 %v1518_v11 }
 0x5dc   :  { %681 = vmatpush.bf16.msra.mxu1 %v1517_v13 }
 0x5e7   :  { %1377 = vmatmul.msk.bf16.vlgmr.msrb.gmra.mxu1 %vm78_vm0, %v1655_v3  ;;  %v1383_v3 = vld [vmem:[%s1932_s1 + $0x10] sm:$0xff] }
 0x5e8   :  { %v1785_v1 = vpack.c.bf16 %v1384_v56, %v1383_v3  ;;  %v788_v56 = vld [vmem:[%s1937_s6] sm:$0xf] }
 0x5f7   :  { %1394 = vmatmul.msk.bf16.vlgmr.msra.gmra.mxu1 %vm53_vm1, %v1803_v17 }
 0x654   :  { %v464_v51 = vpop.f32.mrf.mxu1 }
 0x655   :  { %v468_v52 = vpack.c.bf16 %v464_v51, %v464_v51 }
 0x657   :  { %1350 = vmatmul.msk.bf16.vlgmr.msra.gmra.mxu2 %vm123_vm2, %v468_v52 }
 0x658   :  { %705 = vmatpush.bf16.msra.mxu2 %v1519_v0 }
 0x65c   :  { %v466_v7 = vpop.f32.mrf.mxu1 }
 0x667   :  { %1378 = vmatmul.msk.bf16.vlgmr.msrb.gmra.mxu2 %vm123_vm2, %v567_v53 }
 0x668   :  { %811 = vmatpush.bf16.msrb.mxu2 %v1522_v44 }
 0x66c   :  { %812 = vmatpush.bf16.msrb.mxu2 %v1521_v45  ;;  %v1528_v45 = vld [vmem:[%s1936_s5 + $0x10] sm:$0xff] }
 0x677   :  { %1399 = vmatmul.msk.bf16.vlgmr.msra.gmra.mxu2 %vm78_vm0, %v1785_v1 }
 0x687   :  { %1419 = vmatmul.msk.bf16.vlgmr.msrb.gmra.mxu2 %vm53_vm1, %v1803_v17 }
 0x6da   :  { %v486_v57 = vpop.f32.mrf.mxu2 }
 0x6db   :  { %v490_v58 = vadd.f32 %v486_v57, %v339_v55 }
 0x6e2   :  { %v488_v59 = vpop.f32.mrf.mxu2 }
 0x6ea   :  { %v584_v60 = vpop.f32.mrf.mxu2 }
 0x6eb   :  { %v585_v61 = vadd.f32 %v1682_v16, %v584_v60  ;;  %v562_v16 = vpop.f32.mrf.mxu1  ;;  %v1524_v60 = vld [vmem:[%s1936_s5 + $0x8] sm:$0xff] }
 0x6ed   :  { %v588_v62 = vsel %vm78_vm0, %v585_v61, -inf }
 0x6ee   :  { %589 = vmax.xlane.f32.xlu0 %v588_v62 }
 0x6f2   :  { %v586_v63 = vpop.f32.mrf.mxu2 }
 0x6f3   :  { %v564_v2 = vpop.f32.mrf.mxu1 }
 0x6f4   :  { %v600_v4 = vpack.c.bf16 %v564_v2, %v562_v16  ;;  %v937_v16 = vsel %vm306_vm3, %v788_v56, 0 }
 0x6f6   :  { %611 = vmatpush.bf16.msrb.mxu0 %v600_v4 }
 0x6fa   :  { %v707_v22 = vpop.f32.mrf.mxu2  ;;  %727 = vmatpush.bf16.msra.mxu0 %v1520_v32 }
 0x6fb   :  { %v683_v26 = vpop.f32.mrf.mxu1 }
 0x6fc   :  { %v734_v31 = vpack.c.bf16 %v683_v26, %v683_v26 }
 0x702   :  { %v709_v23 = vpop.f32.mrf.mxu2 }
 0x703   :  { %v735_v24 = vpack.c.bf16 %v709_v23, %v707_v22  ;;  %v685_v27 = vpop.f32.mrf.mxu1  ;;  %v1527_v23 = vld [vmem:[%s1935_s4 + $0x10] sm:$0xff] }
 0x705   :  { %v743_v25 = vsel %vm123_vm2, %v735_v24, 0  ;;  %v1526_v24 = vld [vmem:[%s1934_s3 + $0x28] sm:$0xff] }
 0x706   :  { %752 = vmatpush.bf16.xpose.msra.mxu3 %v743_v25  ;;  %v1525_v25 = vld [vmem:[%s1934_s3 + $0x20] sm:$0xff] }
 0x761   :  { %v590_v5 = vpop.xlane.xlu0 %589 }
 0x762   :  { %v591_v6 = vsub.f32 %v585_v61, %v590_v5 }
 0x764   :  { %v592_v8 = vmul.f32 1.442695, %v591_v6 }
 0x766   :  { %1552 = vpow2.f32 %v592_v8 }
 0x76c   :  { %v1553_v9 = vpop.eup %1552 }
 0x76d   :  { %v594_v10 = vsel %vm78_vm0, %v1553_v9, 0.0 }
 0x76e   :  { %595 = vadd.xlane.f32.xlu1 %v594_v10 }
 0x7e1   :  { %v596_v18 = vpop.xlane.xlu1 %595 }
 0x7e2   :  { %1554 = vrcp.f32 %v596_v18 }
 0x7e8   :  { %v1555_v19 = vpop.eup %1554 }
 0x7e9   :  { %v598_v20 = vmul.f32 %v1555_v19, %v1553_v9 }
 0x7eb   :  { %v599_v21 = vpack.c.bf16 %v598_v20, %v598_v20 }
 0x7ed   :  { %1379 = vmatmul.msk.bf16.vlgmr.msrb.gmra.mxu0 %vm78_vm0, %v599_v21 }
 0x7ee   :  { %833 = vmatpush.bf16.msrb.mxu0 %v1523_v43 }
 0x7fd   :  { %1404 = vmatmul.msk.bf16.vlgmr.msra.gmra.mxu0 %vm78_vm0, %v1785_v1 }
 0x80d   :  { %1426 = vmatmul.msk.bf16.vlgmr.msrb.gmra.mxu0 %vm78_vm0, %v1785_v1 }
 0x86a   :  { %v613_v28 = vpop.f32.mrf.mxu0 }
 0x86b   :  { %v617_v29 = vpack.c.bf16 %v613_v28, %v613_v28 }
 0x86d   :  { %1381 = vmatmul.msk.bf16.vlgmr.msrb.gmra.mxu3 %vm123_vm2, %v617_v29 }
 0x86e   :  { %855 = vmatpush.bf16.msrb.mxu3 %v1524_v60  ;;  %v1468_v60 = vld [vmem:[%s1937_s6 + $0x8] sm:$0xf] }
 0x872   :  { %v615_v30 = vpop.f32.mrf.mxu0 }
 0x873   :  { %v1436_v30 = vld [vmem:[%s1937_s6 + $0x4] sm:$0xf] }
 0x87a   :  { %v729_v46 = vpop.f32.mrf.mxu0 }
 0x87d   :  { %1405 = vmatmul.msk.bf16.vlgmr.msra.gmra.mxu3 %vm123_vm2, %v734_v31  ;;  %v918_v31 = vsel %vm306_vm3, %v1436_v30, 0 }
 0x87e   :  { %946 = vmatpush.bf16.msra.mxu3 %v937_v16  ;;  %927 = vmatpush.bf16.msra.mxu0 %v918_v31 }
 0x882   :  { %v731_v47 = vpop.f32.mrf.mxu0  ;;  %1018 = vmatpush.bf16.msrb.mxu0 %v1528_v45 }
 0x883   :  { %v770_v48 = vpack.c.bf16 %v731_v47, %v729_v46 }
 0x885   :  { %781 = vmatpush.bf16.msrb.mxu1 %v770_v48 }
 0x88a   :  { %v835_v53 = vpop.f32.mrf.mxu0 }
 0x88d   :  { %1433 = vmatmul.msk.bf16.vlgmr.msrb.gmra.mxu3 %vm78_vm0, %v1785_v1 }
 0x892   :  { %v837_v54 = vpop.f32.mrf.mxu0 }
 0x893   :  { %v863_v55 = vpack.c.bf16 %v837_v54, %v835_v53 }
 0x895   :  { %v868_v57 = vsel %vm123_vm2, %v863_v55, 0 }
 0x896   :  { %877 = vmatpush.bf16.xpose.msra.mxu1 %v868_v57 }
 0x8f0   :  { %v635_v34 = vpop.f32.mrf.mxu3 }
 0x8f1   :  { %v639_v35 = vadd.f32 %v635_v34, %v490_v58  ;;  %v814_v58 = vpop.f32.mrf.mxu2 }
 0x8f2   :  { %v862_v3 = vpack.c.bf16 %v814_v58, %v814_v58 }
 0x8f3   :  { %v644_v36 = vadd.f32 %v1537_v33, %v639_v35 }
 0x8f5   :  { %645 = vst.msk [vmem:[#allocation2] sm:$0xff] %vm53_vm1, %v644_v36 }
 0x8f8   :  { %v637_v37 = vpop.f32.mrf.mxu3 }
 0x8f9   :  { %v816_v59 = vpop.f32.mrf.mxu2 }
 0x8fa   :  { %v1530_v59 = vld [vmem:[%s1934_s3 + $0x38] sm:$0xff] }
 0x900   :  { %v754_v39 = vpop.f32.mrf.mxu3 }
 0x901   :  { %v755_v40 = vadd.f32 %v1823_v38, %v754_v39 }
 0x903   :  { %v758_v41 = vsel %vm78_vm0, %v755_v40, -inf }
 0x904   :  { %759 = vmax.xlane.f32.xlu2 %v758_v41 }
 0x908   :  { %v756_v42 = vpop.f32.mrf.mxu3 }
 0x910   :  { %v857_v2 = vpop.f32.mrf.mxu3 }
 0x918   :  { %v859_v6 = vpop.f32.mrf.mxu3 }
 0x919   :  { %v895_v8 = vpack.c.bf16 %v859_v6, %v857_v2 }
 0x91b   :  { %906 = vmatpush.bf16.msra.mxu2 %v895_v8 }
 0x91f   :  { %996 = vmatpush.bf16.msrb.mxu2 %v1527_v23 }
 0x977   :  { %v760_v49 = vpop.xlane.xlu2 %759 }
 0x978   :  { %v761_v50 = vsub.f32 %v755_v40, %v760_v49 }
 0x97a   :  { %v762_v51 = vmul.f32 1.442695, %v761_v50  ;;  %v1531_v50 = vld [vmem:[%s1935_s4 + $0x18] sm:$0xff] }
 0x97c   :  { %1556 = vpow2.f32 %v762_v51 }
 0x982   :  { %v1557_v52 = vpop.eup %1556 }
 0x983   :  { %v764_v7 = vsel %vm78_vm0, %v1557_v52, 0.0 }
 0x984   :  { %765 = vadd.xlane.f32.xlu0 %v764_v7 }
 0x9f7   :  { %v766_v61 = vpop.xlane.xlu0 %765 }
 0x9f8   :  { %1558 = vrcp.f32 %v766_v61  ;;  %v1529_v61 = vld [vmem:[%s1934_s3 + $0x30] sm:$0xff] }
 0x9fe   :  { %v1559_v62 = vpop.eup %1558 }
 0x9ff   :  { %v768_v63 = vmul.f32 %v1559_v62, %v1557_v52  ;;  %v1081_v62 = vsel %vm306_vm3, %v1468_v60, 0 }
 0xa01   :  { %v769_v0 = vpack.c.bf16 %v768_v63, %v768_v63 }
 0xa03   :  { %1406 = vmatmul.msk.bf16.vlgmr.msrb.gmra.mxu1 %vm78_vm0, %v769_v0 }
 0xa04   :  { %974 = vmatpush.bf16.msrb.mxu1 %v1526_v24 }
 0xa08   :  { %975 = vmatpush.bf16.msrb.mxu1 %v1525_v25 }
 0xa13   :  { %1434 = vmatmul.msk.bf16.vlgmr.msra.gmra.mxu1 %vm123_vm2, %v862_v3 }
 0xa23   :  { %1451 = vmatmul.msk.bf16.vlgmr.msrb.gmra.mxu1 %vm53_vm1, %v1803_v17 }
 0xa80   :  { %v783_v4 = vpop.f32.mrf.mxu1 }
 0xa81   :  { %v787_v5 = vpack.c.bf16 %v783_v4, %v783_v4 }
 0xa83   :  { %1438 = vmatmul.msk.bf16.vlgmr.msra.gmra.mxu3 %vm123_vm2, %v787_v5 }
 0xa88   :  { %v785_v9 = vpop.f32.mrf.mxu1 }
 0xa90   :  { %v879_v10 = vpop.f32.mrf.mxu1 }
 0xa91   :  { %v880_v11 = vadd.f32 %v1823_v38, %v879_v10 }
 0xa93   :  { %v883_v12 = vsel %vm78_vm0, %v880_v11, -inf }
 0xa94   :  { %884 = vmax.xlane.f32.xlu1 %v883_v12  ;;  %v1532_v12 = vld [vmem:[%s1936_s5 + $0x18] sm:$0xff] }
 0xa98   :  { %v881_v13 = vpop.f32.mrf.mxu1 }
 0xaa0   :  { %v977_v32 = vpop.f32.mrf.mxu1 }
 0xaa1   :  { %v1025_v42 = vpack.c.bf16 %v977_v32, %v977_v32 }
 0xaa8   :  { %v979_v34 = vpop.f32.mrf.mxu1 }
 0xb06   :  { %v1856_v14 = vpop.f32.mrf.mxu3 }
 0xb07   :  { %v885_v15 = vpop.xlane.xlu1 %884 }
 0xb08   :  { %v886_v18 = vsub.f32 %v880_v11, %v885_v15 }
 0xb0a   :  { %v887_v19 = vmul.f32 1.442695, %v886_v18 }
 0xb0c   :  { %1560 = vpow2.f32 %v887_v19 }
 0xb0e   :  { %v950_v20 = vpop.f32.mrf.mxu3 }
 0xb12   :  { %v1561_v21 = vpop.eup %1560 }
 0xb13   :  { %v889_v22 = vsel %vm78_vm0, %v1561_v21, 0.0 }
 0xb14   :  { %890 = vadd.xlane.f32.xlu2 %v889_v22 }
 0xb87   :  { %v891_v26 = vpop.xlane.xlu2 %890 }
 0xb88   :  { %1562 = vrcp.f32 %v891_v26 }
 0xb8e   :  { %v1563_v27 = vpop.eup %1562 }
 0xb8f   :  { %v893_v28 = vmul.f32 %v1563_v27, %v1561_v21 }
 0xb91   :  { %v894_v29 = vpack.c.bf16 %v893_v28, %v893_v28 }
 0xb93   :  { %1435 = vmatmul.msk.bf16.vlgmr.msra.gmra.mxu2 %vm78_vm0, %v894_v29 }
 0xb94   :  { %1090 = vmatpush.bf16.msra.mxu2 %v1081_v62 }
 0xba3   :  { %1458 = vmatmul.msk.bf16.vlgmr.msrb.gmra.mxu2 %vm78_vm0, %v1785_v1 }
 0xc16   :  { %v908_v33 = vpop.f32.mrf.mxu2 }
 0xc17   :  { %v912_v35 = vpack.c.bf16 %v908_v33, %v908_v33 }
 0xc19   :  { %1437 = vmatmul.msk.bf16.vlgmr.msra.gmra.mxu0 %vm123_vm2, %v912_v35 }
 0xc1a   :  { %1119 = vmatpush.bf16.msra.mxu0 %v1530_v59 }
 0xc1e   :  { %v910_v36 = vpop.f32.mrf.mxu2  ;;  %1120 = vmatpush.bf16.msra.mxu0 %v1529_v61 }
 0xc26   :  { %v998_v37 = vpop.f32.mrf.mxu2 }
 0xc29   :  { %1465 = vmatmul.msk.bf16.vlgmr.msrb.gmra.mxu0 %vm78_vm0, %v1785_v1 }
 0xc2e   :  { %v1000_v39 = vpop.f32.mrf.mxu2 }
 0xc2f   :  { %v1026_v40 = vpack.c.bf16 %v1000_v39, %v998_v37  ;;  %v1539_v39 = vld [vmem:[%s1938_s7] ss:$0 sm:$0xff] }
 0xc31   :  { %v1031_v41 = vsel %vm123_vm2, %v1026_v40, 0 }
 0xc32   :  { %1040 = vmatpush.bf16.xpose.msrb.mxu3 %v1031_v41 }
 0xc39   :  { %1466 = vmatmul.msk.bf16.vlgmr.msrb.gmra.mxu3 %vm123_vm2, %v1025_v42  ;;  %1482 = vmatmul.msk.bf16.vlgmr.msra.gmra.mxu0 %vm53_vm1, %v1803_v17 }
 0xc3a   :  { %1141 = vmatpush.bf16.msra.mxu3 %v1531_v50 }
 0xc49   :  { %1489 = vmatmul.msk.bf16.vlgmr.msra.gmra.mxu3 %vm78_vm0, %v1785_v1 }
 0xc96   :  { %v929_v43 = vpop.f32.mrf.mxu0 }
 0xc97   :  { %v949_v13 = vadd.f32 %v1856_v14, %v929_v43 }
 0xc9e   :  { %v931_v44 = vpop.f32.mrf.mxu0 }
 0xca6   :  { %v1020_v51 = vpop.f32.mrf.mxu0 }
 0xcae   :  { %v1022_v52 = vpop.f32.mrf.mxu0 }
 0xcaf   :  { %v1058_v7 = vpack.c.bf16 %v1022_v52, %v1020_v51 }
 0xcb1   :  { %1069 = vmatpush.bf16.msra.mxu1 %v1058_v7 }
 0xcb5   :  { %1163 = vmatpush.bf16.msrb.mxu1 %v1532_v12 }
 0xcb6   :  { %v1122_v6 = vpop.f32.mrf.mxu0 }
 0xcb7   :  { %v1170_v11 = vpack.c.bf16 %v1122_v6, %v1122_v6 }
 0xcbc   :  { %v1042_v46 = vpop.f32.mrf.mxu3 }
 0xcbd   :  { %v1043_v47 = vadd.f32 %v1823_v38, %v1042_v46 }
 0xcbe   :  { %v1124_v8 = vpop.f32.mrf.mxu0 }
 0xcbf   :  { %v1046_v48 = vsel %vm78_vm0, %v1043_v47, -inf }
 0xcc0   :  { %1047 = vmax.xlane.f32.xlu0 %v1046_v48 }
 0xcc4   :  { %v1044_v49 = vpop.f32.mrf.mxu3 }
 0xccc   :  { %v1143_v16 = vpop.f32.mrf.mxu3 }
 0xcd4   :  { %v1145_v2 = vpop.f32.mrf.mxu3 }
 0xcd5   :  { %v1171_v4 = vpack.c.bf16 %v1145_v2, %v1143_v16 }
 0xcd7   :  { %v1176_v5 = vsel %vm123_vm2, %v1171_v4, 0 }
 0xcd8   :  { %1185 = vmatpush.bf16.xpose.msrb.mxu2 %v1176_v5 }
 0xd33   :  { %v1048_v53 = vpop.xlane.xlu0 %1047 }
 0xd34   :  { %v1049_v54 = vsub.f32 %v1043_v47, %v1048_v53 }
 0xd36   :  { %v1050_v55 = vmul.f32 1.442695, %v1049_v54 }
 0xd38   :  { %1564 = vpow2.f32 %v1050_v55 }
 0xd3e   :  { %v1565_v57 = vpop.eup %1564 }
 0xd3f   :  { %v1052_v58 = vsel %vm78_vm0, %v1565_v57, 0.0 }
 0xd40   :  { %1053 = vadd.xlane.f32.xlu1 %v1052_v58 }
 0xdb3   :  { %v1054_v63 = vpop.xlane.xlu1 %1053 }
 0xdb4   :  { %1566 = vrcp.f32 %v1054_v63 }
 0xdba   :  { %v1567_v0 = vpop.eup %1566 }
 0xdbb   :  { %v1056_v3 = vmul.f32 %v1567_v0, %v1565_v57 }
 0xdbd   :  { %v1057_v56 = vpack.c.bf16 %v1056_v3, %v1056_v3 }
 0xdbf   :  { %1467 = vmatmul.msk.bf16.vlgmr.msra.gmra.mxu1 %vm78_vm0, %v1057_v56 }
 0xdcf   :  { %1496 = vmatmul.msk.bf16.vlgmr.msrb.gmra.mxu1 %vm78_vm0, %v1785_v1 }
 0xe3c   :  { %v1071_v9 = vpop.f32.mrf.mxu1 }
 0xe3d   :  { %v1075_v10 = vpack.c.bf16 %v1071_v9, %v1071_v9 }
 0xe3f   :  { %1469 = vmatmul.msk.bf16.vlgmr.msra.gmra.mxu2 %vm123_vm2, %v1075_v10 }
 0xe44   :  { %v1073_v17 = vpop.f32.mrf.mxu1 }
 0xe4c   :  { %v1165_v24 = vpop.f32.mrf.mxu1 }
 0xe4f   :  { %1497 = vmatmul.msk.bf16.vlgmr.msrb.gmra.mxu2 %vm123_vm2, %v1170_v11 }
 0xe54   :  { %v1167_v25 = vpop.f32.mrf.mxu1 }
 0xe55   :  { %v1203_v26 = vpack.c.bf16 %v1167_v25, %v1165_v24 }
 0xe57   :  { %1214 = vmatpush.bf16.msrb.mxu0 %v1203_v26 }
 0xec2   :  { %v1092_v15 = vpop.f32.mrf.mxu2 }
 0xec3   :  { %v1096_v18 = vadd.f32 %v1092_v15, %v949_v13 }
 0xeca   :  { %v1094_v19 = vpop.f32.mrf.mxu2 }
 0xed2   :  { %v1187_v20 = vpop.f32.mrf.mxu2 }
 0xed3   :  { %v1188_v21 = vadd.f32 %v1823_v38, %v1187_v20  ;;  %v1499_v38 = vld [vmem:[%s1937_s6 + $0xc] sm:$0xf]  ;;  %s1598_s6 = smov [#allocation2]  }
 0xed4   :  { %v1226_v30 = vsel %vm306_vm3, %v1499_v38, 0  ;;  %s1253_s30 = sshll.u32 %s1598_s6, 4  ;;  %s1254_s30 = int_to_ptr.vmem [resolvable:$true] %s1253_s30 }
 0xed5   :  { %v1191_v22 = vsel %vm78_vm0, %v1188_v21, -inf  ;;  %1235 = vmatpush.bf16.msrb.mxu3 %v1226_v30 }
 0xed6   :  { %1192 = vmax.xlane.f32.xlu2 %v1191_v22 }
 0xeda   :  { %v1189_v23 = vpop.f32.mrf.mxu2 }
 0xf49   :  { %v1193_v27 = vpop.xlane.xlu2 %1192 }
 0xf4a   :  { %v1194_v28 = vsub.f32 %v1188_v21, %v1193_v27 }
 0xf4c   :  { %v1195_v29 = vmul.f32 1.442695, %v1194_v28 }
 0xf4e   :  { %1568 = vpow2.f32 %v1195_v29 }
 0xf54   :  { %v1569_v1 = vpop.eup %1568 }
 0xf55   :  { %v1197_v14 = vsel %vm78_vm0, %v1569_v1, 0.0 }
 0xf56   :  { %1198 = vadd.xlane.f32.xlu0 %v1197_v14 }
 0xfc9   :  { %v1199_v31 = vpop.xlane.xlu0 %1198 }
 0xfca   :  { %1570 = vrcp.f32 %v1199_v31 }
 0xfd0   :  { %v1571_v32 = vpop.eup %1570 }
 0xfd1   :  { %v1201_v33 = vmul.f32 %v1571_v32, %v1569_v1 }
 0xfd3   :  { %v1202_v34 = vpack.c.bf16 %v1201_v33, %v1201_v33 }
 0xfd5   :  { %1498 = vmatmul.msk.bf16.vlgmr.msrb.gmra.mxu0 %vm78_vm0, %v1202_v34 }
0x1052   :  { %v1216_v35 = vpop.f32.mrf.mxu0 }
0x1053   :  { %v1220_v36 = vpack.c.bf16 %v1216_v35, %v1216_v35 }
0x1055   :  { %1500 = vmatmul.msk.bf16.vlgmr.msrb.gmra.mxu3 %vm123_vm2, %v1220_v36 }
0x105a   :  { %v1218_v37 = vpop.f32.mrf.mxu0 }
0x10d8   :  { %v1237_v40 = vpop.f32.mrf.mxu3 }
0x10d9   :  { %v1241_v41 = vadd.f32 %v1237_v40, %v1096_v18 }
0x10db   :  { %v1246_v42 = vadd.f32 %v1539_v39, %v1241_v41 }
0x10dd   :  { %1248 = vst.msk [vmem:[#allocation2 + $0x8] sm:$0xff] %vm53_vm1, %v1246_v42 }
0x10de   :  { %1261 = dma.vmem_to_hbm [thread:$0]  %s1254_s30, 256, %s1256_s11, [#allocation3], %s1599_s12, %s1599_s12, %s1600_s13  }
0x10e0   :  { %v1239_v43 = vpop.f32.mrf.mxu3 }
0x10e1   :  { %1596 = dma.done.wait [#allocation3], 256  }
0x10e2   :  { %1597 = vsyncadd [#allocation3], 4294967040 }
0x10e3   :  { %1266 = vsyncpa [#allocation3], 1 }

</bundles_post_ra>
